<compile_context>
chip_gen: v6e
topology: v6e:2x2x1
jax: 0.10.0
libtpu: 0.0.40
codegen_flags: <defaults>
</compile_context>

<pallas_src>
import functools
import math

import jax
import jax.numpy as jnp
from jax.experimental import pallas as pl
from jax.experimental.pallas import tpu as pltpu


# ----------------------------- math helpers (kernel + reference) -----------------------------
def _layernorm(x, g, b, eps=1e-5):
    mu = jnp.mean(x, axis=-1, keepdims=True)
    xc = x - mu
    var = jnp.mean(xc * xc, axis=-1, keepdims=True)
    return xc * jax.lax.rsqrt(var + eps) * g + b


def _sigmoid(x):
    return 1.0 / (1.0 + jnp.exp(-x))


# ------------------------------------- fused kernel ------------------------------------------
def fused_block_kernel(slot_ref,                       # scalar-prefetch: layer -> output slot
                       x_ref,                          # pre-normed tokens [bb, L, D] (f32)
                       ln1_g_ref, ln1_b_ref, w_in_ref, b_in_ref,
                       w_out_ref, b_out_ref, ln2_g_ref, ln2_b_ref,
                       w_fc_ref, b_fc_ref, w_proj_ref, b_proj_ref,
                       out_ref, acc_ref, oh_ref, *, n_head, mlp_chunk):
    """grid = (batch_blocks, layers).  acc_ref: f32 residual stream; oh_ref: bf16 head concat."""
    del slot_ref                                       # only consumed by the out_spec index_map
    layer = pl.program_id(1)
    bf = jnp.bfloat16

    # Residual stream stays resident in VMEM across the ("arbitrary") layer axis.
    @pl.when(layer == 0)
    def _():
        acc_ref[...] = x_ref[...]

    x = acc_ref[...]                                   # [bb, L, D] f32
    bb, L, D = x.shape
    hd = D // n_head
    scale = 1.0 / math.sqrt(hd)

    # ---------------- x = x + attn(ln_1(x)) ----------------
    h = _layernorm(x, ln1_g_ref[0], ln1_b_ref[0])
    h2d = h.reshape(bb * L, D).astype(bf)
    # one wide-K QKV matmul (pre-transposed [D, 3D] bf16 weight) -> f32 accumulation
    qkv = jnp.dot(h2d, w_in_ref[0], preferred_element_type=jnp.float32) + b_in_ref[0]
    q = qkv[:, :D].reshape(bb, L, D)
    k = qkv[:, D:2 * D].reshape(bb, L, D)
    v = qkv[:, 2 * D:].reshape(bb, L, D)

    # Per-head attention; head outputs are concatenated into oh_ref so the output projection
    # is a single K=D matmul (full MXU contraction) instead of n_head K=hd GEMMs.
    for hh in range(n_head):                           # static unroll; n_head is small
        sl = slice(hh * hd, (hh + 1) * hd)
        qh = (q[:, :, sl] * scale).astype(bf)
        kh = k[:, :, sl].astype(bf)
        vh = v[:, :, sl].astype(bf)
        s = jnp.einsum('bqd,bkd->bqk', qh, kh,
                       preferred_element_type=jnp.float32)                # [bb, L, L] f32
        s = s - jnp.max(s, axis=-1, keepdims=True)
        e = jnp.exp(s)                                                     # f32 (EUP)
        p = e * pl.reciprocal(jnp.sum(e, axis=-1, keepdims=True), approx=True)
        oh = jnp.einsum('bqk,bkd->bqd', p.astype(bf), vh,
                        preferred_element_type=jnp.float32)                # [bb, L, hd]
        oh_ref[:, :, sl] = oh.astype(bf)               # write into head-concat scratch (bf16)

    attn = jnp.dot(oh_ref[...].reshape(bb * L, D), w_out_ref[0],
                   preferred_element_type=jnp.float32) + b_out_ref[0]      # one K=D GEMM
    x = x + attn.reshape(bb, L, D)

    # ---------------- x = x + mlp(ln_2(x)) ----------------
    h2 = _layernorm(x, ln2_g_ref[0], ln2_b_ref[0])
    h2d2 = h2.reshape(bb * L, D).astype(bf)
    m = jnp.zeros((bb * L, D), jnp.float32)
    n_chunks = (4 * D) // mlp_chunk
    for c in range(n_chunks):                          # bound the f32 [bb*L, 4D] intermediate
        lo = c * mlp_chunk
        f = jnp.dot(h2d2, w_fc_ref[0, :, lo:lo + mlp_chunk],
                    preferred_element_type=jnp.float32) + b_fc_ref[0, :, lo:lo + mlp_chunk]
        f = f * _sigmoid(1.702 * f)                    # QuickGELU (f32)
        m = m + jnp.dot(f.astype(bf), w_proj_ref[0, lo:lo + mlp_chunk, :],
                        preferred_element_type=jnp.float32)
    x = x + (m + b_proj_ref[0]).reshape(bb, L, D)

    acc_ref[...] = x
    out_ref[0] = x.astype(out_ref.dtype)               # bf16 writeback (f_list slots only)


# ------------------------------------- sizing helpers ----------------------------------------
def _vmem_capacity_bytes():
    try:
        return int(pltpu.get_tpu_info().vmem_capacity_bytes)
    except Exception:
        return 64 << 20                                # conservative default (v7x per-TC)


def _choose_mlp_chunk(D):
    hidden = 4 * D
    if hidden <= 1024:
        return hidden
    for cand in (1024, 768, 512, 384, 256, 128):
        if hidden % cand == 0:
            return cand
    return hidden


def _vmem_need_bytes(bb, L, D, mlp_chunk):
    """Rough VMEM footprint of the fused layer loop at batch_block bb."""
    w_bf16 = 12 * D * D * 2                            # W_in[D,3D] + W_out[D,D] + W_fc[D,4D] + W_proj[4D,D]
    small = 14 * D * 4                                 # biases + LN params (f32)
    weights = 2 * (w_bf16 + small)                     # double-buffered across the layer axis
    # resident: x input (2 buffers f32) + residual scratch (f32) + head-concat (bf16) + out block (2 x bf16)
    resident = bb * L * D * (2 * 4 + 4 + 2 + 2 * 2)
    # in-flight activations: qkv f32 [bb*L,3D], h/h2 bf16, per-head scores f32 [bb,L,L],
    # attn/m f32 [bb*L,D], MLP chunk f32 [bb*L,chunk] (x2 for gelu temp)
    act = bb * L * (3 * D * 4 + 2 * D * 2 + L * 4 + 2 * D * 4 + 2 * mlp_chunk * 4)
    return weights + resident + act + (2 << 20)


def _choose_batch_block(B, L, D, mlp_chunk, budget):
    """Largest divisor of B whose footprint fits the VMEM budget (weights streamed B/bb times)."""
    best = 1
    for d in range(1, B + 1):
        if B % d != 0:
            continue
        if d > 1 and L % 8 != 0:                       # keep [bb,L,D] <-> [bb*L,D] reshapes layout-preserving
            break
        if _vmem_need_bytes(d, L, D, mlp_chunk) <= budget:
            best = d
    return best


# ------------------------------------- pallas_call wrapper -----------------------------------
def transformer_call(x, params, n_head, f_list, batch_block=None, out_dtype=jnp.bfloat16):
    """x: [B, L, D] tokens AFTER pos-add + ln_pre.

    Returns (out[n_slots, B, L, D] (out_dtype), slot_of: layer_idx -> slot, n_layers)."""
    B, L, D = x.shape
    blk = params['blk']
    n_layers = blk['w_in_t'].shape[0]
    assert D % n_head == 0
    assert all(1 <= f <= n_layers for f in f_list)

    mlp_chunk = _choose_mlp_chunk(D)
    capacity = _vmem_capacity_bytes()
    budget = max(capacity - (16 << 20), 16 << 20)      # leave headroom vs physical VMEM
    bb = batch_block if batch_block is not None else _choose_batch_block(B, L, D, mlp_chunk, budget)
    assert B % bb == 0
    if bb > 1:
        assert L % 8 == 0
    vmem_limit = int(min(capacity - (4 << 20),
                         max(32 << 20, int(1.25 * _vmem_need_bytes(bb, L, D, mlp_chunk)))))

    # layer -> output slot. Only layers in f_list (plus the final layer) get a real slot;
    # every other layer maps to the slot of the NEXT selected layer, so the slot sequence is
    # monotone over the layer axis (no output-block revisit) and unselected layers incur no
    # extra HBM writeback (writeback happens only when the output block index changes).
    selected = sorted(set([f - 1 for f in f_list] + [n_layers - 1]))
    slot_of = {l: i for i, l in enumerate(selected)}
    n_slots = len(selected)
    table, nxt = [], 0
    for l in range(n_layers):
        while selected[nxt] < l:
            nxt += 1
        table.append(slot_of[selected[nxt]])
    slot_table = jnp.asarray(table, dtype=jnp.int32)

    def x_map(b, l, s): return (b, 0, 0)
    def lyr3(b, l, s): return (l, 0, 0)
    def out_map(b, l, s): return (s[l], b, 0, 0)

    in_specs = [
        pl.BlockSpec((bb, L, D), x_map),               # pre-normed tokens (f32)
        pl.BlockSpec((1, 1, D), lyr3),                 # ln1 gamma
        pl.BlockSpec((1, 1, D), lyr3),                 # ln1 beta
        pl.BlockSpec((1, D, 3 * D), lyr3),             # W_in^T   (bf16)
        pl.BlockSpec((1, 1, 3 * D), lyr3),             # b_in
        pl.BlockSpec((1, D, D), lyr3),                 # W_out^T  (bf16)
        pl.BlockSpec((1, 1, D), lyr3),                 # b_out
        pl.BlockSpec((1, 1, D), lyr3),                 # ln2 gamma
        pl.BlockSpec((1, 1, D), lyr3),                 # ln2 beta
        pl.BlockSpec((1, D, 4 * D), lyr3),             # W_fc^T   (bf16)
        pl.BlockSpec((1, 1, 4 * D), lyr3),             # b_fc
        pl.BlockSpec((1, 4 * D, D), lyr3),             # W_proj^T (bf16)
        pl.BlockSpec((1, 1, D), lyr3),                 # b_proj
    ]

    grid_spec = pltpu.PrefetchScalarGridSpec(
        num_scalar_prefetch=1,
        grid=(B // bb, n_layers),
        in_specs=in_specs,
        out_specs=pl.BlockSpec((1, bb, L, D), out_map),
        scratch_shapes=[pltpu.VMEM((bb, L, D), jnp.float32),    # residual stream
                        pltpu.VMEM((bb, L, D), jnp.bfloat16)])  # head-concat buffer

    out = pl.pallas_call(
        functools.partial(fused_block_kernel, n_head=n_head, mlp_chunk=mlp_chunk),
        out_shape=jax.ShapeDtypeStruct((n_slots, B, L, D), out_dtype),
        grid_spec=grid_spec,
        compiler_params=pltpu.CompilerParams(
            dimension_semantics=("parallel", "arbitrary"),
            vmem_limit_bytes=vmem_limit),
    )(slot_table, x, blk['ln1_g'], blk['ln1_b'], blk['w_in_t'], blk['b_in'],
      blk['w_out_t'], blk['b_out'], blk['ln2_g'], blk['ln2_b'],
      blk['w_fc_t'], blk['b_fc'], blk['w_proj_t'], blk['b_proj'])
    return out, slot_of, n_layers


# ------------------------------------- module forward ----------------------------------------
def de_vit_forward(x_nchw, params, f_list, n_head, batch_block=None):
    B, C, H, W = x_nchw.shape
    L = H * W
    # tensor_to_patch: [B, C, H, W] -> [B, H*W, C]  (layout plumbing outside the kernel)
    x = jnp.transpose(x_nchw.reshape(B, C, L), (0, 2, 1))
    # pos-add + ln_pre run in the XLA wrapper (tiny) so the fused kernel does not keep
    # pos / ln_pre params resident in VMEM across the whole layer loop.
    x = _layernorm(x + params['pos'][1:][None], params['ln_pre_g'], params['ln_pre_b'])
    out, slot_of, n_layers = transformer_call(x, params, n_head, f_list, batch_block=batch_block)
    # Kernel writes bf16; cast back to f32 at the boundary to preserve the module's dtype contract.
    x_final = out[slot_of[n_layers - 1]].astype(jnp.float32)                      # [B, L, C]
    patch_tokens = [jnp.transpose(out[slot_of[i - 1]].astype(jnp.float32),
                                  (0, 2, 1)).reshape(B, C, H, W) for i in f_list]
    return x_final, patch_tokens


# ------------------------------------- pure-JAX reference ------------------------------------
def ref_forward(x_nchw, params, f_list, n_head):
    B, C, H, W = x_nchw.shape
    L = H * W
    hd = C // n_head
    blk = params['blk']
    n_layers = blk['w_in_t'].shape[0]
    x = jnp.transpose(x_nchw.reshape(B, C, L), (0, 2, 1))
    x = x + params['pos'][1:][None]
    x = _layernorm(x, params['ln_pre_g'], params['ln_pre_b'])
    outs = []
    for l in range(n_layers):
        h = _layernorm(x, blk['ln1_g'][l], blk['ln1_b'][l])
        qkv = h @ blk['w_in_t'][l].astype(jnp.float32) + blk['b_in'][l]
        q, k, v = jnp.split(qkv, 3, axis=-1)
        q = q.reshape(B, L, n_head, hd)
        k = k.reshape(B, L, n_head, hd)
        v = v.reshape(B, L, n_head, hd)
        s = jnp.einsum('bqhd,bkhd->bhqk', q, k) / math.sqrt(hd)
        p = jax.nn.softmax(s, axis=-1)
        o = jnp.einsum('bhqk,bkhd->bqhd', p, v).reshape(B, L, C)
        x = x + o @ blk['w_out_t'][l].astype(jnp.float32) + blk['b_out'][l]
        h2 = _layernorm(x, blk['ln2_g'][l], blk['ln2_b'][l])
        f = h2 @ blk['w_fc_t'][l].astype(jnp.float32) + blk['b_fc'][l]
        f = f * _sigmoid(1.702 * f)
        x = x + f @ blk['w_proj_t'][l].astype(jnp.float32) + blk['b_proj'][l]
        if (l + 1) in f_list:
            outs.append(x)
    patch = [jnp.transpose(t, (0, 2, 1)).reshape(B, C, H, W) for t in outs]
    return x, patch


# ------------------------------------- parameter init ----------------------------------------
def init_params(key, input_resolution, patch_size, width, layers, heads, output_dim):
    g = input_resolution // patch_size
    w = width
    scale = w ** (-0.5)
    keys = jax.random.split(key, 4 + layers)
    p = {}
    # Defined by __init__ but unused by de_VisionTransformer.forward (shape fidelity only):
    p['conv1_w'] = scale * jax.random.normal(keys[0], (w, 3, patch_size, patch_size), jnp.float32)
    p['class_embedding'] = scale * jax.random.normal(keys[1], (w,), jnp.float32)
    p['proj'] = scale * jax.random.normal(keys[2], (w, output_dim), jnp.float32)
    p['ln_post_g'] = jnp.ones((1, w), jnp.float32)
    p['ln_post_b'] = jnp.zeros((1, w), jnp.float32)
    # Used by forward:
    p['pos'] = scale * jax.random.normal(keys[3], (g * g + 1, w), jnp.float32)
    p['ln_pre_g'] = jnp.ones((1, w), jnp.float32)
    p['ln_pre_b'] = jnp.zeros((1, w), jnp.float32)

    ln1_g, ln1_b, ln2_g, ln2_b = [], [], [], []
    w_in_t, b_in, w_out_t, b_out = [], [], [], []
    w_fc_t, b_fc, w_proj_t, b_proj = [], [], [], []
    for l in range(layers):
        bk = jax.random.split(keys[4 + l], 8)
        w_in = scale * jax.random.normal(bk[0], (3 * w, w), jnp.float32)              # in_proj_weight
        w_out = scale * jax.random.normal(bk[2], (w, w), jnp.float32)                 # out_proj.weight
        w_fc = scale * jax.random.normal(bk[4], (4 * w, w), jnp.float32)              # c_fc.weight
        w_pj = (4 * w) ** (-0.5) * jax.random.normal(bk[6], (w, 4 * w), jnp.float32)  # c_proj.weight
        ln1_g.append(jnp.ones((1, w), jnp.float32)); ln1_b.append(jnp.zeros((1, w), jnp.float32))
        ln2_g.append(jnp.ones((1, w), jnp.float32)); ln2_b.append(jnp.zeros((1, w), jnp.float32))
        # Host-side pre-transpose (kernel never transposes) + bf16 weight storage.
        w_in_t.append(w_in.T.astype(jnp.bfloat16))                                    # [w, 3w]
        w_out_t.append(w_out.T.astype(jnp.bfloat16))                                  # [w, w]
        w_fc_t.append(w_fc.T.astype(jnp.bfloat16))                                    # [w, 4w]
        w_proj_t.append(w_pj.T.astype(jnp.bfloat16))                                  # [4w, w]
        b_in.append(0.01 * jax.random.normal(bk[1], (1, 3 * w), jnp.float32))
        b_out.append(0.01 * jax.random.normal(bk[3], (1, w), jnp.float32))
        b_fc.append(0.01 * jax.random.normal(bk[5], (1, 4 * w), jnp.float32))
        b_proj.append(0.01 * jax.random.normal(bk[7], (1, w), jnp.float32))
    p['blk'] = dict(
        ln1_g=jnp.stack(ln1_g), ln1_b=jnp.stack(ln1_b),
        ln2_g=jnp.stack(ln2_g), ln2_b=jnp.stack(ln2_b),
        w_in_t=jnp.stack(w_in_t), b_in=jnp.stack(b_in),
        w_out_t=jnp.stack(w_out_t), b_out=jnp.stack(b_out),
        w_fc_t=jnp.stack(w_fc_t), b_fc=jnp.stack(b_fc),
        w_proj_t=jnp.stack(w_proj_t), b_proj=jnp.stack(b_proj),
    )
    return p


# ----------------------------------------- main ----------------------------------------------
if __name__ == "__main__":
    key = jax.random.PRNGKey(0)
    input_resolution, patch_size = 16, 4          # grid = 4, L = 16
    width, layers, heads, output_dim = 32, 2, 4, 16
    B = 2
    grid = input_resolution // patch_size

    kp, kx = jax.random.split(key)
    params = init_params(kp, input_resolution, patch_size, width, layers, heads, output_dim)

    # forward input: width-channel feature map (tensor_to_patch -> [B, L, width])
    x = jax.random.normal(kx, (B, width, grid, grid), jnp.float32)
    f_list = [1, 2]

    out, patch_tokens = de_vit_forward(x, params, f_list, heads)   # batch_block auto-sized
    out = jax.block_until_ready(out)
    patch_tokens = [jax.block_until_ready(t) for t in patch_tokens]

    ref_out, ref_patch = ref_forward(x, params, f_list, heads)
    assert out.shape == (B, grid * grid, width)
    # bf16 matmul operands + bf16 HBM writeback (intentional, per perf guidance) vs f32 reference.
    assert jnp.allclose(out, ref_out, atol=5e-2, rtol=5e-2), \
        float(jnp.max(jnp.abs(out - ref_out)))
    assert len(patch_tokens) == len(ref_patch)
    for a, b in zip(patch_tokens, ref_patch):
        assert a.shape == (B, width, grid, grid)
        assert jnp.allclose(a, b, atol=5e-2, rtol=5e-2)

    print("KERNEL_OK")
</pallas_src>

<mosaic_0001>
module attributes {stable_mosaic.version = 11 : i64} {
  func.func @fused_block_kernel(%arg0: i32, %arg1: i32, %arg2: memref<2xi32, #tpu.memory_space<smem>>, %arg3: memref<2x16x32xf32, #tpu.memory_space<vmem>>, %arg4: memref<1x1x32xf32, #tpu.memory_space<vmem>>, %arg5: memref<1x1x32xf32, #tpu.memory_space<vmem>>, %arg6: memref<1x32x96xbf16, #tpu.memory_space<vmem>>, %arg7: memref<1x1x96xf32, #tpu.memory_space<vmem>>, %arg8: memref<1x32x32xbf16, #tpu.memory_space<vmem>>, %arg9: memref<1x1x32xf32, #tpu.memory_space<vmem>>, %arg10: memref<1x1x32xf32, #tpu.memory_space<vmem>>, %arg11: memref<1x1x32xf32, #tpu.memory_space<vmem>>, %arg12: memref<1x32x128xbf16, #tpu.memory_space<vmem>>, %arg13: memref<1x1x128xf32, #tpu.memory_space<vmem>>, %arg14: memref<1x128x32xbf16, #tpu.memory_space<vmem>>, %arg15: memref<1x1x32xf32, #tpu.memory_space<vmem>>, %arg16: memref<1x2x16x32xbf16, #tpu.memory_space<vmem>>, %arg17: memref<2x16x32xf32, #tpu.memory_space<vmem>>, %arg18: memref<2x16x32xbf16, #tpu.memory_space<vmem>>) attributes {dimension_semantics = [#tpu.dimension_semantics<parallel>, #tpu.dimension_semantics<arbitrary>], iteration_bounds = array<i64: 1, 2>, scalar_prefetch = 1 : i64, scratch_operands = 2 : i64, tpu.core_type = #tpu.core_type<tc>, window_params = [{transform_indices = @transform_0, window_bounds = array<i64: 2, 16, 32>}, {transform_indices = @transform_1, window_bounds = array<i64: 1, 1, 32>}, {transform_indices = @transform_2, window_bounds = array<i64: 1, 1, 32>}, {transform_indices = @transform_3, window_bounds = array<i64: 1, 32, 96>}, {transform_indices = @transform_4, window_bounds = array<i64: 1, 1, 96>}, {transform_indices = @transform_5, window_bounds = array<i64: 1, 32, 32>}, {transform_indices = @transform_6, window_bounds = array<i64: 1, 1, 32>}, {transform_indices = @transform_7, window_bounds = array<i64: 1, 1, 32>}, {transform_indices = @transform_8, window_bounds = array<i64: 1, 1, 32>}, {transform_indices = @transform_9, window_bounds = array<i64: 1, 32, 128>}, {transform_indices = @transform_10, window_bounds = array<i64: 1, 1, 128>}, {transform_indices = @transform_11, window_bounds = array<i64: 1, 128, 32>}, {transform_indices = @transform_12, window_bounds = array<i64: 1, 1, 32>}, {transform_indices = @transform_13, window_bounds = array<i64: 1, 2, 16, 32>}]} {
    %c0_i32 = arith.constant 0 : i32
    %0 = arith.cmpi eq, %arg1, %c0_i32 : i32
    %1 = arith.extui %0 : i1 to i32
    %c0_i32_0 = arith.constant 0 : i32
    %2 = arith.cmpi ne, %1, %c0_i32_0 : i32
    scf.if %2 {
      %c0_96 = arith.constant 0 : index
      %c0_97 = arith.constant 0 : index
      %c0_98 = arith.constant 0 : index
      %210 = vector.load %arg3[%c0_96, %c0_97, %c0_98] : memref<2x16x32xf32, #tpu.memory_space<vmem>>, vector<2x16x32xf32>
      %c0_99 = arith.constant 0 : index
      %c0_100 = arith.constant 0 : index
      %c0_101 = arith.constant 0 : index
      %211 = vector.load %arg17[%c0_99, %c0_100, %c0_101] : memref<2x16x32xf32, #tpu.memory_space<vmem>>, vector<2x16x32xf32>
      tpu.vector_store %arg17[%c0_99, %c0_100, %c0_101], %210 {strides = array<i32>} : memref<2x16x32xf32, #tpu.memory_space<vmem>>, vector<2x16x32xf32>,
    } else {
    }
    %c0 = arith.constant 0 : index
    %c0_1 = arith.constant 0 : index
    %c0_2 = arith.constant 0 : index
    %3 = vector.load %arg17[%c0, %c0_1, %c0_2] : memref<2x16x32xf32, #tpu.memory_space<vmem>>, vector<2x16x32xf32>
    %c0_3 = arith.constant 0 : index
    %c0_4 = arith.constant 0 : index
    %c0_5 = arith.constant 0 : index
    %4 = vector.load %arg4[%c0_3, %c0_4, %c0_5] : memref<1x1x32xf32, #tpu.memory_space<vmem>>, vector<1x1x32xf32>
    %5 = vector.shape_cast %4 : vector<1x1x32xf32> to vector<1x32xf32>
    %c0_6 = arith.constant 0 : index
    %c0_7 = arith.constant 0 : index
    %c0_8 = arith.constant 0 : index
    %6 = vector.load %arg5[%c0_6, %c0_7, %c0_8] : memref<1x1x32xf32, #tpu.memory_space<vmem>>, vector<1x1x32xf32>
    %7 = vector.shape_cast %6 : vector<1x1x32xf32> to vector<1x32xf32>
    %cst = arith.constant dense<0.000000e+00> : vector<2x16xf32>
    %8 = vector.multi_reduction <add>, %3, %cst [2] : vector<2x16x32xf32> to vector<2x16xf32>
    %9 = vector.shape_cast %8 : vector<2x16xf32> to vector<2x16x1xf32>
    %cst_9 = arith.constant 3.200000e+01 : f32
    %10 = vector.broadcast %cst_9 : f32 to vector<2x16x1xf32>
    %11 = arith.divf %9, %10 : vector<2x16x1xf32>
    %12 = vector.broadcast %11 : vector<2x16x1xf32> to vector<2x16x32xf32>
    %13 = arith.subf %3, %12 : vector<2x16x32xf32>
    %14 = arith.mulf %13, %13 : vector<2x16x32xf32>
    %cst_10 = arith.constant dense<0.000000e+00> : vector<2x16xf32>
    %15 = vector.multi_reduction <add>, %14, %cst_10 [2] : vector<2x16x32xf32> to vector<2x16xf32>
    %16 = vector.shape_cast %15 : vector<2x16xf32> to vector<2x16x1xf32>
    %cst_11 = arith.constant 3.200000e+01 : f32
    %17 = vector.broadcast %cst_11 : f32 to vector<2x16x1xf32>
    %18 = arith.divf %16, %17 : vector<2x16x1xf32>
    %cst_12 = arith.constant 9.99999974E-6 : f32
    %19 = vector.broadcast %cst_12 : f32 to vector<2x16x1xf32>
    %20 = arith.addf %18, %19 : vector<2x16x1xf32>
    %21 = math.rsqrt %20 : vector<2x16x1xf32>
    %22 = vector.broadcast %21 : vector<2x16x1xf32> to vector<2x16x32xf32>
    %23 = arith.mulf %13, %22 : vector<2x16x32xf32>
    %24 = vector.shape_cast %5 : vector<1x32xf32> to vector<1x1x32xf32>
    %25 = vector.broadcast %24 : vector<1x1x32xf32> to vector<2x16x32xf32>
    %26 = arith.mulf %23, %25 : vector<2x16x32xf32>
    %27 = vector.shape_cast %7 : vector<1x32xf32> to vector<1x1x32xf32>
    %28 = vector.broadcast %27 : vector<1x1x32xf32> to vector<2x16x32xf32>
    %29 = arith.addf %26, %28 : vector<2x16x32xf32>
    %30 = vector.shape_cast %29 : vector<2x16x32xf32> to vector<32x32xf32>
    %31 = arith.truncf %30 : vector<32x32xf32> to vector<32x32xbf16>
    %c0_13 = arith.constant 0 : index
    %c0_14 = arith.constant 0 : index
    %c0_15 = arith.constant 0 : index
    %32 = vector.load %arg6[%c0_13, %c0_14, %c0_15] : memref<1x32x96xbf16, #tpu.memory_space<vmem>>, vector<1x32x96xbf16>
    %33 = vector.shape_cast %32 : vector<1x32x96xbf16> to vector<32x96xbf16>
    %cst_16 = arith.constant dense<0.000000e+00> : vector<32x96xf32>
    %34 = tpu.matmul %31, %33, %cst_16 {dimension_numbers = #tpu.dot_dimension_numbers<[1], [0], [0], [1], [0, 0, 1, 1], [], []>} : vector<32x32xbf16>, vector<32x96xbf16>, vector<32x96xf32> -> vector<32x96xf32>
    %c0_17 = arith.constant 0 : index
    %c0_18 = arith.constant 0 : index
    %c0_19 = arith.constant 0 : index
    %35 = vector.load %arg7[%c0_17, %c0_18, %c0_19] : memref<1x1x96xf32, #tpu.memory_space<vmem>>, vector<1x1x96xf32>
    %36 = vector.shape_cast %35 : vector<1x1x96xf32> to vector<1x96xf32>
    %37 = vector.broadcast %36 : vector<1x96xf32> to vector<32x96xf32>
    %38 = arith.addf %34, %37 : vector<32x96xf32>
    %39 = vector.extract_strided_slice %38 {offsets = [0, 0], sizes = [32, 32], strides = [1, 1]} : vector<32x96xf32> to vector<32x32xf32>
    %40 = vector.shape_cast %39 : vector<32x32xf32> to vector<2x16x32xf32>
    %41 = vector.extract_strided_slice %38 {offsets = [0, 32], sizes = [32, 32], strides = [1, 1]} : vector<32x96xf32> to vector<32x32xf32>
    %42 = vector.shape_cast %41 : vector<32x32xf32> to vector<2x16x32xf32>
    %43 = vector.extract_strided_slice %38 {offsets = [0, 64], sizes = [32, 32], strides = [1, 1]} : vector<32x96xf32> to vector<32x32xf32>
    %44 = vector.shape_cast %43 : vector<32x32xf32> to vector<2x16x32xf32>
    %45 = vector.extract_strided_slice %40 {offsets = [0, 0, 0], sizes = [2, 16, 8], strides = [1, 1, 1]} : vector<2x16x32xf32> to vector<2x16x8xf32>
    %cst_20 = arith.constant 0.353553385 : f32
    %46 = vector.broadcast %cst_20 : f32 to vector<2x16x8xf32>
    %47 = arith.mulf %45, %46 : vector<2x16x8xf32>
    %48 = arith.truncf %47 : vector<2x16x8xf32> to vector<2x16x8xbf16>
    %49 = vector.extract_strided_slice %42 {offsets = [0, 0, 0], sizes = [2, 16, 8], strides = [1, 1, 1]} : vector<2x16x32xf32> to vector<2x16x8xf32>
    %50 = arith.truncf %49 : vector<2x16x8xf32> to vector<2x16x8xbf16>
    %51 = vector.extract_strided_slice %44 {offsets = [0, 0, 0], sizes = [2, 16, 8], strides = [1, 1, 1]} : vector<2x16x32xf32> to vector<2x16x8xf32>
    %52 = arith.truncf %51 : vector<2x16x8xf32> to vector<2x16x8xbf16>
    "tpu.trace_start"() <{level = 10 : i32, message = "bqd,bkd->bqk"}> : () -> ()
    %cst_21 = arith.constant dense<0.000000e+00> : vector<2x16x16xf32>
    %53 = tpu.matmul %48, %50, %cst_21 {dimension_numbers = #tpu.dot_dimension_numbers<[2], [2], [1], [1], [0, 0, 0, 1, 1, 1], [0], [0]>} : vector<2x16x8xbf16>, vector<2x16x8xbf16>, vector<2x16x16xf32> -> vector<2x16x16xf32>
    "tpu.trace_stop"() : () -> ()
    %cst_22 = arith.constant dense<0xFF800000> : vector<2x16xf32>
    %54 = vector.multi_reduction <maximumf>, %53, %cst_22 [2] : vector<2x16x16xf32> to vector<2x16xf32>
    %55 = vector.shape_cast %54 : vector<2x16xf32> to vector<2x16x1xf32>
    %56 = vector.broadcast %55 : vector<2x16x1xf32> to vector<2x16x16xf32>
    %57 = arith.subf %53, %56 : vector<2x16x16xf32>
    %58 = math.exp %57 : vector<2x16x16xf32>
    %cst_23 = arith.constant dense<0.000000e+00> : vector<2x16xf32>
    %59 = vector.multi_reduction <add>, %58, %cst_23 [2] : vector<2x16x16xf32> to vector<2x16xf32>
    %60 = vector.shape_cast %59 : vector<2x16xf32> to vector<2x16x1xf32>
    %61 = tpu.reciprocal %60 {approx = true} : vector<2x16x1xf32> -> vector<2x16x1xf32>
    %62 = vector.broadcast %61 : vector<2x16x1xf32> to vector<2x16x16xf32>
    %63 = arith.mulf %58, %62 : vector<2x16x16xf32>
    %64 = arith.truncf %63 : vector<2x16x16xf32> to vector<2x16x16xbf16>
    "tpu.trace_start"() <{level = 10 : i32, message = "bqk,bkd->bqd"}> : () -> ()
    %cst_24 = arith.constant dense<0.000000e+00> : vector<2x16x8xf32>
    %65 = tpu.matmul %64, %52, %cst_24 {dimension_numbers = #tpu.dot_dimension_numbers<[2], [1], [1], [2], [0, 0, 0, 1, 1, 2], [0], [0]>} : vector<2x16x16xbf16>, vector<2x16x8xbf16>, vector<2x16x8xf32> -> vector<2x16x8xf32>
    "tpu.trace_stop"() : () -> ()
    %66 = arith.truncf %65 : vector<2x16x8xf32> to vector<2x16x8xbf16>
    %c0_25 = arith.constant 0 : index
    %c0_26 = arith.constant 0 : index
    %c0_27 = arith.constant 0 : index
    %67 = vector.load %arg18[%c0_25, %c0_26, %c0_27] : memref<2x16x32xbf16, #tpu.memory_space<vmem>>, vector<2x16x8xbf16>
    tpu.vector_store %arg18[%c0_25, %c0_26, %c0_27], %66 {strides = array<i32>} : memref<2x16x32xbf16, #tpu.memory_space<vmem>>, vector<2x16x8xbf16>,
    %68 = vector.extract_strided_slice %40 {offsets = [0, 0, 8], sizes = [2, 16, 8], strides = [1, 1, 1]} : vector<2x16x32xf32> to vector<2x16x8xf32>
    %cst_28 = arith.constant 0.353553385 : f32
    %69 = vector.broadcast %cst_28 : f32 to vector<2x16x8xf32>
    %70 = arith.mulf %68, %69 : vector<2x16x8xf32>
    %71 = arith.truncf %70 : vector<2x16x8xf32> to vector<2x16x8xbf16>
    %72 = vector.extract_strided_slice %42 {offsets = [0, 0, 8], sizes = [2, 16, 8], strides = [1, 1, 1]} : vector<2x16x32xf32> to vector<2x16x8xf32>
    %73 = arith.truncf %72 : vector<2x16x8xf32> to vector<2x16x8xbf16>
    %74 = vector.extract_strided_slice %44 {offsets = [0, 0, 8], sizes = [2, 16, 8], strides = [1, 1, 1]} : vector<2x16x32xf32> to vector<2x16x8xf32>
    %75 = arith.truncf %74 : vector<2x16x8xf32> to vector<2x16x8xbf16>
    "tpu.trace_start"() <{level = 10 : i32, message = "bqd,bkd->bqk"}> : () -> ()
    %cst_29 = arith.constant dense<0.000000e+00> : vector<2x16x16xf32>
    %76 = tpu.matmul %71, %73, %cst_29 {dimension_numbers = #tpu.dot_dimension_numbers<[2], [2], [1], [1], [0, 0, 0, 1, 1, 1], [0], [0]>} : vector<2x16x8xbf16>, vector<2x16x8xbf16>, vector<2x16x16xf32> -> vector<2x16x16xf32>
    "tpu.trace_stop"() : () -> ()
    %cst_30 = arith.constant dense<0xFF800000> : vector<2x16xf32>
    %77 = vector.multi_reduction <maximumf>, %76, %cst_30 [2] : vector<2x16x16xf32> to vector<2x16xf32>
    %78 = vector.shape_cast %77 : vector<2x16xf32> to vector<2x16x1xf32>
    %79 = vector.broadcast %78 : vector<2x16x1xf32> to vector<2x16x16xf32>
    %80 = arith.subf %76, %79 : vector<2x16x16xf32>
    %81 = math.exp %80 : vector<2x16x16xf32>
    %cst_31 = arith.constant dense<0.000000e+00> : vector<2x16xf32>
    %82 = vector.multi_reduction <add>, %81, %cst_31 [2] : vector<2x16x16xf32> to vector<2x16xf32>
    %83 = vector.shape_cast %82 : vector<2x16xf32> to vector<2x16x1xf32>
    %84 = tpu.reciprocal %83 {approx = true} : vector<2x16x1xf32> -> vector<2x16x1xf32>
    %85 = vector.broadcast %84 : vector<2x16x1xf32> to vector<2x16x16xf32>
    %86 = arith.mulf %81, %85 : vector<2x16x16xf32>
    %87 = arith.truncf %86 : vector<2x16x16xf32> to vector<2x16x16xbf16>
    "tpu.trace_start"() <{level = 10 : i32, message = "bqk,bkd->bqd"}> : () -> ()
    %cst_32 = arith.constant dense<0.000000e+00> : vector<2x16x8xf32>
    %88 = tpu.matmul %87, %75, %cst_32 {dimension_numbers = #tpu.dot_dimension_numbers<[2], [1], [1], [2], [0, 0, 0, 1, 1, 2], [0], [0]>} : vector<2x16x16xbf16>, vector<2x16x8xbf16>, vector<2x16x8xf32> -> vector<2x16x8xf32>
    "tpu.trace_stop"() : () -> ()
    %89 = arith.truncf %88 : vector<2x16x8xf32> to vector<2x16x8xbf16>
    %c0_33 = arith.constant 0 : index
    %c0_34 = arith.constant 0 : index
    %c8 = arith.constant 8 : index
    %90 = vector.load %arg18[%c0_33, %c0_34, %c8] : memref<2x16x32xbf16, #tpu.memory_space<vmem>>, vector<2x16x8xbf16>
    tpu.vector_store %arg18[%c0_33, %c0_34, %c8], %89 {strides = array<i32>} : memref<2x16x32xbf16, #tpu.memory_space<vmem>>, vector<2x16x8xbf16>,
    %91 = vector.extract_strided_slice %40 {offsets = [0, 0, 16], sizes = [2, 16, 8], strides = [1, 1, 1]} : vector<2x16x32xf32> to vector<2x16x8xf32>
    %cst_35 = arith.constant 0.353553385 : f32
    %92 = vector.broadcast %cst_35 : f32 to vector<2x16x8xf32>
    %93 = arith.mulf %91, %92 : vector<2x16x8xf32>
    %94 = arith.truncf %93 : vector<2x16x8xf32> to vector<2x16x8xbf16>
    %95 = vector.extract_strided_slice %42 {offsets = [0, 0, 16], sizes = [2, 16, 8], strides = [1, 1, 1]} : vector<2x16x32xf32> to vector<2x16x8xf32>
    %96 = arith.truncf %95 : vector<2x16x8xf32> to vector<2x16x8xbf16>
    %97 = vector.extract_strided_slice %44 {offsets = [0, 0, 16], sizes = [2, 16, 8], strides = [1, 1, 1]} : vector<2x16x32xf32> to vector<2x16x8xf32>
    %98 = arith.truncf %97 : vector<2x16x8xf32> to vector<2x16x8xbf16>
    "tpu.trace_start"() <{level = 10 : i32, message = "bqd,bkd->bqk"}> : () -> ()
    %cst_36 = arith.constant dense<0.000000e+00> : vector<2x16x16xf32>
    %99 = tpu.matmul %94, %96, %cst_36 {dimension_numbers = #tpu.dot_dimension_numbers<[2], [2], [1], [1], [0, 0, 0, 1, 1, 1], [0], [0]>} : vector<2x16x8xbf16>, vector<2x16x8xbf16>, vector<2x16x16xf32> -> vector<2x16x16xf32>
    "tpu.trace_stop"() : () -> ()
    %cst_37 = arith.constant dense<0xFF800000> : vector<2x16xf32>
    %100 = vector.multi_reduction <maximumf>, %99, %cst_37 [2] : vector<2x16x16xf32> to vector<2x16xf32>
    %101 = vector.shape_cast %100 : vector<2x16xf32> to vector<2x16x1xf32>
    %102 = vector.broadcast %101 : vector<2x16x1xf32> to vector<2x16x16xf32>
    %103 = arith.subf %99, %102 : vector<2x16x16xf32>
    %104 = math.exp %103 : vector<2x16x16xf32>
    %cst_38 = arith.constant dense<0.000000e+00> : vector<2x16xf32>
    %105 = vector.multi_reduction <add>, %104, %cst_38 [2] : vector<2x16x16xf32> to vector<2x16xf32>
    %106 = vector.shape_cast %105 : vector<2x16xf32> to vector<2x16x1xf32>
    %107 = tpu.reciprocal %106 {approx = true} : vector<2x16x1xf32> -> vector<2x16x1xf32>
    %108 = vector.broadcast %107 : vector<2x16x1xf32> to vector<2x16x16xf32>
    %109 = arith.mulf %104, %108 : vector<2x16x16xf32>
    %110 = arith.truncf %109 : vector<2x16x16xf32> to vector<2x16x16xbf16>
    "tpu.trace_start"() <{level = 10 : i32, message = "bqk,bkd->bqd"}> : () -> ()
    %cst_39 = arith.constant dense<0.000000e+00> : vector<2x16x8xf32>
    %111 = tpu.matmul %110, %98, %cst_39 {dimension_numbers = #tpu.dot_dimension_numbers<[2], [1], [1], [2], [0, 0, 0, 1, 1, 2], [0], [0]>} : vector<2x16x16xbf16>, vector<2x16x8xbf16>, vector<2x16x8xf32> -> vector<2x16x8xf32>
    "tpu.trace_stop"() : () -> ()
    %112 = arith.truncf %111 : vector<2x16x8xf32> to vector<2x16x8xbf16>
    %c0_40 = arith.constant 0 : index
    %c0_41 = arith.constant 0 : index
    %c16 = arith.constant 16 : index
    %113 = vector.load %arg18[%c0_40, %c0_41, %c16] : memref<2x16x32xbf16, #tpu.memory_space<vmem>>, vector<2x16x8xbf16>
    tpu.vector_store %arg18[%c0_40, %c0_41, %c16], %112 {strides = array<i32>} : memref<2x16x32xbf16, #tpu.memory_space<vmem>>, vector<2x16x8xbf16>,
    %114 = vector.extract_strided_slice %40 {offsets = [0, 0, 24], sizes = [2, 16, 8], strides = [1, 1, 1]} : vector<2x16x32xf32> to vector<2x16x8xf32>
    %cst_42 = arith.constant 0.353553385 : f32
    %115 = vector.broadcast %cst_42 : f32 to vector<2x16x8xf32>
    %116 = arith.mulf %114, %115 : vector<2x16x8xf32>
    %117 = arith.truncf %116 : vector<2x16x8xf32> to vector<2x16x8xbf16>
    %118 = vector.extract_strided_slice %42 {offsets = [0, 0, 24], sizes = [2, 16, 8], strides = [1, 1, 1]} : vector<2x16x32xf32> to vector<2x16x8xf32>
    %119 = arith.truncf %118 : vector<2x16x8xf32> to vector<2x16x8xbf16>
    %120 = vector.extract_strided_slice %44 {offsets = [0, 0, 24], sizes = [2, 16, 8], strides = [1, 1, 1]} : vector<2x16x32xf32> to vector<2x16x8xf32>
    %121 = arith.truncf %120 : vector<2x16x8xf32> to vector<2x16x8xbf16>
    "tpu.trace_start"() <{level = 10 : i32, message = "bqd,bkd->bqk"}> : () -> ()
    %cst_43 = arith.constant dense<0.000000e+00> : vector<2x16x16xf32>
    %122 = tpu.matmul %117, %119, %cst_43 {dimension_numbers = #tpu.dot_dimension_numbers<[2], [2], [1], [1], [0, 0, 0, 1, 1, 1], [0], [0]>} : vector<2x16x8xbf16>, vector<2x16x8xbf16>, vector<2x16x16xf32> -> vector<2x16x16xf32>
    "tpu.trace_stop"() : () -> ()
    %cst_44 = arith.constant dense<0xFF800000> : vector<2x16xf32>
    %123 = vector.multi_reduction <maximumf>, %122, %cst_44 [2] : vector<2x16x16xf32> to vector<2x16xf32>
    %124 = vector.shape_cast %123 : vector<2x16xf32> to vector<2x16x1xf32>
    %125 = vector.broadcast %124 : vector<2x16x1xf32> to vector<2x16x16xf32>
    %126 = arith.subf %122, %125 : vector<2x16x16xf32>
    %127 = math.exp %126 : vector<2x16x16xf32>
    %cst_45 = arith.constant dense<0.000000e+00> : vector<2x16xf32>
    %128 = vector.multi_reduction <add>, %127, %cst_45 [2] : vector<2x16x16xf32> to vector<2x16xf32>
    %129 = vector.shape_cast %128 : vector<2x16xf32> to vector<2x16x1xf32>
    %130 = tpu.reciprocal %129 {approx = true} : vector<2x16x1xf32> -> vector<2x16x1xf32>
    %131 = vector.broadcast %130 : vector<2x16x1xf32> to vector<2x16x16xf32>
    %132 = arith.mulf %127, %131 : vector<2x16x16xf32>
    %133 = arith.truncf %132 : vector<2x16x16xf32> to vector<2x16x16xbf16>
    "tpu.trace_start"() <{level = 10 : i32, message = "bqk,bkd->bqd"}> : () -> ()
    %cst_46 = arith.constant dense<0.000000e+00> : vector<2x16x8xf32>
    %134 = tpu.matmul %133, %121, %cst_46 {dimension_numbers = #tpu.dot_dimension_numbers<[2], [1], [1], [2], [0, 0, 0, 1, 1, 2], [0], [0]>} : vector<2x16x16xbf16>, vector<2x16x8xbf16>, vector<2x16x8xf32> -> vector<2x16x8xf32>
    "tpu.trace_stop"() : () -> ()
    %135 = arith.truncf %134 : vector<2x16x8xf32> to vector<2x16x8xbf16>
    %c0_47 = arith.constant 0 : index
    %c0_48 = arith.constant 0 : index
    %c24 = arith.constant 24 : index
    %136 = vector.load %arg18[%c0_47, %c0_48, %c24] : memref<2x16x32xbf16, #tpu.memory_space<vmem>>, vector<2x16x8xbf16>
    tpu.vector_store %arg18[%c0_47, %c0_48, %c24], %135 {strides = array<i32>} : memref<2x16x32xbf16, #tpu.memory_space<vmem>>, vector<2x16x8xbf16>,
    %c0_49 = arith.constant 0 : index
    %c0_50 = arith.constant 0 : index
    %c0_51 = arith.constant 0 : index
    %137 = vector.load %arg18[%c0_49, %c0_50, %c0_51] : memref<2x16x32xbf16, #tpu.memory_space<vmem>>, vector<2x16x32xbf16>
    %138 = vector.shape_cast %137 : vector<2x16x32xbf16> to vector<32x32xbf16>
    %c0_52 = arith.constant 0 : index
    %c0_53 = arith.constant 0 : index
    %c0_54 = arith.constant 0 : index
    %139 = vector.load %arg8[%c0_52, %c0_53, %c0_54] : memref<1x32x32xbf16, #tpu.memory_space<vmem>>, vector<1x32x32xbf16>
    %140 = vector.shape_cast %139 : vector<1x32x32xbf16> to vector<32x32xbf16>
    %cst_55 = arith.constant dense<0.000000e+00> : vector<32x32xf32>
    %141 = tpu.matmul %138, %140, %cst_55 {dimension_numbers = #tpu.dot_dimension_numbers<[1], [0], [0], [1], [0, 0, 1, 1], [], []>} : vector<32x32xbf16>, vector<32x32xbf16>, vector<32x32xf32> -> vector<32x32xf32>
    %c0_56 = arith.constant 0 : index
    %c0_57 = arith.constant 0 : index
    %c0_58 = arith.constant 0 : index
    %142 = vector.load %arg9[%c0_56, %c0_57, %c0_58] : memref<1x1x32xf32, #tpu.memory_space<vmem>>, vector<1x1x32xf32>
    %143 = vector.shape_cast %142 : vector<1x1x32xf32> to vector<1x32xf32>
    %144 = vector.broadcast %143 : vector<1x32xf32> to vector<32x32xf32>
    %145 = arith.addf %141, %144 : vector<32x32xf32>
    %146 = vector.shape_cast %145 : vector<32x32xf32> to vector<2x16x32xf32>
    %147 = arith.addf %3, %146 : vector<2x16x32xf32>
    %c0_59 = arith.constant 0 : index
    %c0_60 = arith.constant 0 : index
    %c0_61 = arith.constant 0 : index
    %148 = vector.load %arg10[%c0_59, %c0_60, %c0_61] : memref<1x1x32xf32, #tpu.memory_space<vmem>>, vector<1x1x32xf32>
    %149 = vector.shape_cast %148 : vector<1x1x32xf32> to vector<1x32xf32>
    %c0_62 = arith.constant 0 : index
    %c0_63 = arith.constant 0 : index
    %c0_64 = arith.constant 0 : index
    %150 = vector.load %arg11[%c0_62, %c0_63, %c0_64] : memref<1x1x32xf32, #tpu.memory_space<vmem>>, vector<1x1x32xf32>
    %151 = vector.shape_cast %150 : vector<1x1x32xf32> to vector<1x32xf32>
    %cst_65 = arith.constant dense<0.000000e+00> : vector<2x16xf32>
    %152 = vector.multi_reduction <add>, %147, %cst_65 [2] : vector<2x16x32xf32> to vector<2x16xf32>
    %153 = vector.shape_cast %152 : vector<2x16xf32> to vector<2x16x1xf32>
    %cst_66 = arith.constant 3.200000e+01 : f32
    %154 = vector.broadcast %cst_66 : f32 to vector<2x16x1xf32>
    %155 = arith.divf %153, %154 : vector<2x16x1xf32>
    %156 = vector.broadcast %155 : vector<2x16x1xf32> to vector<2x16x32xf32>
    %157 = arith.subf %147, %156 : vector<2x16x32xf32>
    %158 = arith.mulf %157, %157 : vector<2x16x32xf32>
    %cst_67 = arith.constant dense<0.000000e+00> : vector<2x16xf32>
    %159 = vector.multi_reduction <add>, %158, %cst_67 [2] : vector<2x16x32xf32> to vector<2x16xf32>
    %160 = vector.shape_cast %159 : vector<2x16xf32> to vector<2x16x1xf32>
    %cst_68 = arith.constant 3.200000e+01 : f32
    %161 = vector.broadcast %cst_68 : f32 to vector<2x16x1xf32>
    %162 = arith.divf %160, %161 : vector<2x16x1xf32>
    %cst_69 = arith.constant 9.99999974E-6 : f32
    %163 = vector.broadcast %cst_69 : f32 to vector<2x16x1xf32>
    %164 = arith.addf %162, %163 : vector<2x16x1xf32>
    %165 = math.rsqrt %164 : vector<2x16x1xf32>
    %166 = vector.broadcast %165 : vector<2x16x1xf32> to vector<2x16x32xf32>
    %167 = arith.mulf %157, %166 : vector<2x16x32xf32>
    %168 = vector.shape_cast %149 : vector<1x32xf32> to vector<1x1x32xf32>
    %169 = vector.broadcast %168 : vector<1x1x32xf32> to vector<2x16x32xf32>
    %170 = arith.mulf %167, %169 : vector<2x16x32xf32>
    %171 = vector.shape_cast %151 : vector<1x32xf32> to vector<1x1x32xf32>
    %172 = vector.broadcast %171 : vector<1x1x32xf32> to vector<2x16x32xf32>
    %173 = arith.addf %170, %172 : vector<2x16x32xf32>
    %174 = vector.shape_cast %173 : vector<2x16x32xf32> to vector<32x32xf32>
    %175 = arith.truncf %174 : vector<32x32xf32> to vector<32x32xbf16>
    %cst_70 = arith.constant 0.000000e+00 : f32
    %176 = vector.broadcast %cst_70 : f32 to vector<32x32xf32>
    %c0_71 = arith.constant 0 : index
    %c0_72 = arith.constant 0 : index
    %c0_73 = arith.constant 0 : index
    %177 = vector.load %arg12[%c0_71, %c0_72, %c0_73] : memref<1x32x128xbf16, #tpu.memory_space<vmem>>, vector<1x32x128xbf16>
    %178 = vector.shape_cast %177 : vector<1x32x128xbf16> to vector<32x128xbf16>
    %cst_74 = arith.constant dense<0.000000e+00> : vector<32x128xf32>
    %179 = tpu.matmul %175, %178, %cst_74 {dimension_numbers = #tpu.dot_dimension_numbers<[1], [0], [0], [1], [0, 0, 1, 1], [], []>} : vector<32x32xbf16>, vector<32x128xbf16>, vector<32x128xf32> -> vector<32x128xf32>
    %c0_75 = arith.constant 0 : index
    %c0_76 = arith.constant 0 : index
    %c0_77 = arith.constant 0 : index
    %180 = vector.load %arg13[%c0_75, %c0_76, %c0_77] : memref<1x1x128xf32, #tpu.memory_space<vmem>>, vector<1x1x128xf32>
    %181 = vector.shape_cast %180 : vector<1x1x128xf32> to vector<1x128xf32>
    %182 = vector.broadcast %181 : vector<1x128xf32> to vector<32x128xf32>
    %183 = arith.addf %179, %182 : vector<32x128xf32>
    %cst_78 = arith.constant 1.702000e+00 : f32
    %184 = vector.broadcast %cst_78 : f32 to vector<32x128xf32>
    %185 = arith.mulf %184, %183 : vector<32x128xf32>
    %cst_79 = arith.constant 0.000000e+00 : f32
    %186 = vector.broadcast %cst_79 : f32 to vector<32x128xf32>
    %187 = arith.subf %186, %185 : vector<32x128xf32>
    %188 = math.exp %187 : vector<32x128xf32>
    %cst_80 = arith.constant 1.000000e+00 : f32
    %189 = vector.broadcast %cst_80 : f32 to vector<32x128xf32>
    %190 = arith.addf %189, %188 : vector<32x128xf32>
    %cst_81 = arith.constant 1.000000e+00 : f32
    %191 = vector.broadcast %cst_81 : f32 to vector<32x128xf32>
    %192 = arith.divf %191, %190 : vector<32x128xf32>
    %193 = arith.mulf %183, %192 : vector<32x128xf32>
    %194 = arith.truncf %193 : vector<32x128xf32> to vector<32x128xbf16>
    %c0_82 = arith.constant 0 : index
    %c0_83 = arith.constant 0 : index
    %c0_84 = arith.constant 0 : index
    %195 = vector.load %arg14[%c0_82, %c0_83, %c0_84] : memref<1x128x32xbf16, #tpu.memory_space<vmem>>, vector<1x128x32xbf16>
    %196 = vector.shape_cast %195 : vector<1x128x32xbf16> to vector<128x32xbf16>
    %cst_85 = arith.constant dense<0.000000e+00> : vector<32x32xf32>
    %197 = tpu.matmul %194, %196, %cst_85 {dimension_numbers = #tpu.dot_dimension_numbers<[1], [0], [0], [1], [0, 0, 1, 1], [], []>} : vector<32x128xbf16>, vector<128x32xbf16>, vector<32x32xf32> -> vector<32x32xf32>
    %198 = arith.addf %176, %197 : vector<32x32xf32>
    %c0_86 = arith.constant 0 : index
    %c0_87 = arith.constant 0 : index
    %c0_88 = arith.constant 0 : index
    %199 = vector.load %arg15[%c0_86, %c0_87, %c0_88] : memref<1x1x32xf32, #tpu.memory_space<vmem>>, vector<1x1x32xf32>
    %200 = vector.shape_cast %199 : vector<1x1x32xf32> to vector<1x32xf32>
    %201 = vector.broadcast %200 : vector<1x32xf32> to vector<32x32xf32>
    %202 = arith.addf %198, %201 : vector<32x32xf32>
    %203 = vector.shape_cast %202 : vector<32x32xf32> to vector<2x16x32xf32>
    %204 = arith.addf %147, %203 : vector<2x16x32xf32>
    %c0_89 = arith.constant 0 : index
    %c0_90 = arith.constant 0 : index
    %c0_91 = arith.constant 0 : index
    %205 = vector.load %arg17[%c0_89, %c0_90, %c0_91] : memref<2x16x32xf32, #tpu.memory_space<vmem>>, vector<2x16x32xf32>
    tpu.vector_store %arg17[%c0_89, %c0_90, %c0_91], %204 {strides = array<i32>} : memref<2x16x32xf32, #tpu.memory_space<vmem>>, vector<2x16x32xf32>,
    %206 = arith.truncf %204 : vector<2x16x32xf32> to vector<2x16x32xbf16>
    %c0_92 = arith.constant 0 : index
    %c0_93 = arith.constant 0 : index
    %c0_94 = arith.constant 0 : index
    %c0_95 = arith.constant 0 : index
    %207 = vector.load %arg16[%c0_92, %c0_93, %c0_94, %c0_95] : memref<1x2x16x32xbf16, #tpu.memory_space<vmem>>, vector<1x2x16x32xbf16>
    %208 = vector.shape_cast %207 : vector<1x2x16x32xbf16> to vector<2x16x32xbf16>
    %209 = vector.shape_cast %206 : vector<2x16x32xbf16> to vector<1x2x16x32xbf16>
    tpu.vector_store %arg16[%c0_92, %c0_93, %c0_94, %c0_95], %209 {strides = array<i32>} : memref<1x2x16x32xbf16, #tpu.memory_space<vmem>>, vector<1x2x16x32xbf16>,
    return
  }
  func.func @transform_0(%arg0: i32, %arg1: i32, %arg2: memref<2xi32, #tpu.memory_space<smem>>) -> (i32, i32, i32) {
    %c0_i32 = arith.constant 0 : i32
    %c0_i32_0 = arith.constant 0 : i32
    %c0_i32_1 = arith.constant 0 : i32
    return %arg0, %c0_i32, %c0_i32_0 : i32, i32, i32
  }
  func.func @transform_1(%arg0: i32, %arg1: i32, %arg2: memref<2xi32, #tpu.memory_space<smem>>) -> (i32, i32, i32) {
    %c0_i32 = arith.constant 0 : i32
    %c0_i32_0 = arith.constant 0 : i32
    %c0_i32_1 = arith.constant 0 : i32
    return %arg1, %c0_i32, %c0_i32_0 : i32, i32, i32
  }
  func.func @transform_2(%arg0: i32, %arg1: i32, %arg2: memref<2xi32, #tpu.memory_space<smem>>) -> (i32, i32, i32) {
    %c0_i32 = arith.constant 0 : i32
    %c0_i32_0 = arith.constant 0 : i32
    %c0_i32_1 = arith.constant 0 : i32
    return %arg1, %c0_i32, %c0_i32_0 : i32, i32, i32
  }
  func.func @transform_3(%arg0: i32, %arg1: i32, %arg2: memref<2xi32, #tpu.memory_space<smem>>) -> (i32, i32, i32) {
    %c0_i32 = arith.constant 0 : i32
    %c0_i32_0 = arith.constant 0 : i32
    %c0_i32_1 = arith.constant 0 : i32
    return %arg1, %c0_i32, %c0_i32_0 : i32, i32, i32
  }
  func.func @transform_4(%arg0: i32, %arg1: i32, %arg2: memref<2xi32, #tpu.memory_space<smem>>) -> (i32, i32, i32) {
    %c0_i32 = arith.constant 0 : i32
    %c0_i32_0 = arith.constant 0 : i32
    %c0_i32_1 = arith.constant 0 : i32
    return %arg1, %c0_i32, %c0_i32_0 : i32, i32, i32
  }
  func.func @transform_5(%arg0: i32, %arg1: i32, %arg2: memref<2xi32, #tpu.memory_space<smem>>) -> (i32, i32, i32) {
    %c0_i32 = arith.constant 0 : i32
    %c0_i32_0 = arith.constant 0 : i32
    %c0_i32_1 = arith.constant 0 : i32
    return %arg1, %c0_i32, %c0_i32_0 : i32, i32, i32
  }
  func.func @transform_6(%arg0: i32, %arg1: i32, %arg2: memref<2xi32, #tpu.memory_space<smem>>) -> (i32, i32, i32) {
    %c0_i32 = arith.constant 0 : i32
    %c0_i32_0 = arith.constant 0 : i32
    %c0_i32_1 = arith.constant 0 : i32
    return %arg1, %c0_i32, %c0_i32_0 : i32, i32, i32
  }
  func.func @transform_7(%arg0: i32, %arg1: i32, %arg2: memref<2xi32, #tpu.memory_space<smem>>) -> (i32, i32, i32) {
    %c0_i32 = arith.constant 0 : i32
    %c0_i32_0 = arith.constant 0 : i32
    %c0_i32_1 = arith.constant 0 : i32
    return %arg1, %c0_i32, %c0_i32_0 : i32, i32, i32
  }
  func.func @transform_8(%arg0: i32, %arg1: i32, %arg2: memref<2xi32, #tpu.memory_space<smem>>) -> (i32, i32, i32) {
    %c0_i32 = arith.constant 0 : i32
    %c0_i32_0 = arith.constant 0 : i32
    %c0_i32_1 = arith.constant 0 : i32
    return %arg1, %c0_i32, %c0_i32_0 : i32, i32, i32
  }
  func.func @transform_9(%arg0: i32, %arg1: i32, %arg2: memref<2xi32, #tpu.memory_space<smem>>) -> (i32, i32, i32) {
    %c0_i32 = arith.constant 0 : i32
    %c0_i32_0 = arith.constant 0 : i32
    %c0_i32_1 = arith.constant 0 : i32
    return %arg1, %c0_i32, %c0_i32_0 : i32, i32, i32
  }
  func.func @transform_10(%arg0: i32, %arg1: i32, %arg2: memref<2xi32, #tpu.memory_space<smem>>) -> (i32, i32, i32) {
    %c0_i32 = arith.constant 0 : i32
    %c0_i32_0 = arith.constant 0 : i32
    %c0_i32_1 = arith.constant 0 : i32
    return %arg1, %c0_i32, %c0_i32_0 : i32, i32, i32
  }
  func.func @transform_11(%arg0: i32, %arg1: i32, %arg2: memref<2xi32, #tpu.memory_space<smem>>) -> (i32, i32, i32) {
    %c0_i32 = arith.constant 0 : i32
    %c0_i32_0 = arith.constant 0 : i32
    %c0_i32_1 = arith.constant 0 : i32
    return %arg1, %c0_i32, %c0_i32_0 : i32, i32, i32
  }
  func.func @transform_12(%arg0: i32, %arg1: i32, %arg2: memref<2xi32, #tpu.memory_space<smem>>) -> (i32, i32, i32) {
    %c0_i32 = arith.constant 0 : i32
    %c0_i32_0 = arith.constant 0 : i32
    %c0_i32_1 = arith.constant 0 : i32
    return %arg1, %c0_i32, %c0_i32_0 : i32, i32, i32
  }
  func.func @transform_13(%arg0: i32, %arg1: i32, %arg2: memref<2xi32, #tpu.memory_space<smem>>) -> (i32, i32, i32, i32) {
    %0 = arith.index_cast %arg1 : i32 to index
    %1 = memref.load %arg2[%0] : memref<2xi32, #tpu.memory_space<smem>>
    %c0_i32 = arith.constant 0 : i32
    %c0_i32_0 = arith.constant 0 : i32
    %c0_i32_1 = arith.constant 0 : i32
    return %1, %arg0, %c0_i32, %c0_i32_0 : i32, i32, i32, i32
  }
}

</mosaic_0001>

<bundles_post_ra>
// kernel: tpu_custom_call.1
= control target key start
LH: loop header
LB: loop body
LE: loop exit
PB: predicated region body
PF: predicated region fallthrough
CT: control target
= control target key end

     0   :  { %s3729_s0 = inlined_call_operand.vmem [shape: s32[2], index: 0, kind: input, shape index: {}]   ;;  %s3730_s1 = inlined_call_operand.vmem [shape: f32[2,16,32], index: 1, kind: input, shape index: {}]   ;;  %s3731_s2 = inlined_call_operand.vmem [shape: f32[2,1,32], index: 2, kind: input, shape index: {}]   ;;  %s3732_s3 = inlined_call_operand.vmem [shape: f32[2,1,32], index: 3, kind: input, shape index: {}]   ;;  %s3733_s4 = inlined_call_operand.vmem [shape: bf16[2,32,96], index: 4, kind: input, shape index: {}]   ;;  %s3734_s5 = inlined_call_operand.vmem [shape: f32[2,1,96], index: 5, kind: input, shape index: {}]   ;;  %s3735_s6 = inlined_call_operand.vmem [shape: bf16[2,32,32], index: 6, kind: input, shape index: {}]   ;;  %s3736_s7 = inlined_call_operand.vmem [shape: f32[2,1,32], index: 7, kind: input, shape index: {}]   ;;  %s3737_s8 = inlined_call_operand.vmem [shape: f32[2,1,32], index: 8, kind: input, shape index: {}]   ;;  %s3738_s9 = inlined_call_operand.vmem [shape: f32[2,1,32], index: 9, kind: input, shape index: {}]   ;;  %s3739_s10 = inlined_call_operand.vmem [shape: bf16[2,32,128], index: 10, kind: input, shape index: {}]   ;;  %s3740_s11 = inlined_call_operand.vmem [shape: f32[2,1,128], index: 11, kind: input, shape index: {}]   ;;  %s3741_s12 = inlined_call_operand.vmem [shape: bf16[2,128,32], index: 12, kind: input, shape index: {}]   ;;  %s3742_s13 = inlined_call_operand.vmem [shape: f32[2,1,32], index: 13, kind: input, shape index: {}]   ;;  %s3743_s14 = inlined_call_operand.hbm [shape: bf16[2,2,16,32], index: 14, kind: output, shape index: {}]  }
   0x1   :  { %3757 = sst [smem:[#allocation21_spill]] %s3732_s3  ;;  %s19_s15 = sshll.u32 %s3729_s0, 4  ;;  %s20_s15 = int_to_ptr.vmem [resolvable:$true] %s19_s15 }
   0x2   :  { %3758 = sst [smem:[#allocation22_spill]] %s3733_s4  ;;  %s3065_s16 = scalar_lea.vmem %s20_s15, 16 }
   0x3   :  { %3759 = sst [smem:[#allocation23_spill]] %s3735_s6  ;;  %p3066_p0 = scmp.ne.s32.totalorder %s20_s15, %s3065_s16 }
   0x4   :  { %3760 = sst [smem:[#allocation24_spill]] %s3743_s14  ;;  %p3070_p1 = scmp.lt.s32.totalorder %s20_s15, %s20_s15 }
   0x5   :  { %p3071_p2 = scmp.lt.s32.totalorder %s3065_s16, %s3065_s16 }
   0x7   :  { %p3072_p3 = por %p3071_p2, %p3070_p1 }
   0x9   :  { %p3073_p4 = pnand %p3072_p3, %p3066_p0 }
   0xb   :  { %3076 = shalt.err (!%p3073_p4)  }
   0xc   :  { %s3157_s17 = smov [#allocation5]  }
   0xd   :  { %22 = dma.vmem_to_smem %s20_s15, 16, %s3157_s17, [#allocation4] }
   0xe   :  { %3127 = dma.done.wait [#allocation4], 16 }
   0xf   :  { %3128 = vsyncadd [#allocation4], 4294967280 }
  0x10   :  { %24 = sfence }
  0x11   :  { %25 = vsyncpa [#allocation7], 0 }
  0x12   :  { %27 = vsyncpa [#allocation7 + $0x1], 0  ;;  %s3254_s18 = smov 0   ;;  %s3256_s19 = smov 0  }
  0x13   :  { %s3258_s0 = smov 0   ;;  %s3260_s20 = smov 0  }
  0x14   :  { %s3262_s21 = smov 0   ;;  %s3264_s22 = smov 0  }
  0x15 LB: > { %3761 = sst [smem:[#allocation11_spill]] %s3135_s18  ;;  %s2568_s23 = sadd.s32 4294967295, %s3155_s22   ;;  %s3155_s22 = sphi %s3264_s22, %s33_s22   ;;  %s3151_s21 = sphi %s3262_s21, %s3793_s21   ;;  %s3147_s20 = sphi %s3260_s20, %s3792_s20   ;;  %s3143_s0 = sphi %s3258_s0, %s3791_s0   ;;  %s3139_s19 = sphi %s3256_s19, %s3790_s19   ;;  %s3135_s18 = sphi %s3254_s18, %s3789_s18  }
  0x16   : > { %3762 = sst [smem:[#allocation12_spill]] %s3139_s19  ;;  %s2569_s24 = sadd.s32 4294967294, %s3155_s22  }
  0x17   : > { %3763 = sst [smem:[#allocation13_spill]] %s3143_s0  ;;  %s42_s25 = sadd.s32 1, %s3151_s21 }
  0x18   : > { %3764 = sst [smem:[#allocation14_spill]] %s3151_s21  ;;  %p43_p5 = scmp.ge.s32.totalorder %s42_s25, 2 }
  0x19   : > { %3765 = sst [smem:[#allocation15_spill]] %s3155_s22  ;;  %p404_p6 = scmp.ne.s32.totalorder %s3143_s0, %s3139_s19 }
  0x1a   : > { %s387_s26 = sld [smem:[#allocation5 + %s3151_s21]]  ;;  %p405_p7 = scmp.eq.s32.totalorder %s2568_s23, 1 }
  0x1b   : > { %s3795_s25 = smov (%p43_p5, %s42_s25), 0  ;;  %p410_p9 = scmp.ne.s32.totalorder %s3139_s19, %s3135_s18 }
  0x1c   : > { %3766 = sst [smem:[#allocation16_spill]] %s3795_s25  ;;  %p3292_p8 = por %p405_p7, %p404_p6 }
  0x1d   : > { %s388_s28 = sld [smem:[#allocation5 + %s3795_s25]]  ;;  %p411_p10 = scmp.eq.s32.totalorder %s2569_s24, 1 }
  0x1e   : > { %s3767_s27 = scalar_select %p3292_p8, 1, 0 }
  0x1f   : > { %p2573_p11 = scmp.ge.s32.totalorder %s3155_s22, 1  ;;  %p519_p12 = scmp.lt.s32.totalorder %s3155_s22, 3 }
  0x20   : > { %3768 = sst [smem:[#allocation17_spill]] %s3767_s27  ;;  %p3301_p13 = por %p411_p10, %p410_p9 }
  0x21   : > { %p520_p0 = pnand %p2573_p11, %p519_p12  ;;  %s394_s15 = sadd.s32 1, %s3143_s0 }
  0x22   : > { %s3769_s29 = scalar_select %p3301_p13, 1, 0 }
  0x23   : > { %s389_s30 = ssub.s32 %s387_s26, %s388_s28 }
  0x24   : > { %3770 = sst [smem:[#allocation18_spill]] %s3769_s29  ;;  %p392_p1 = scmp.eq.s32.totalorder %s389_s30, 0 }
  0x25   : > { %523 = sbr.rel (%p520_p0) target bundleno = 4175 (0x104f), region = 72 }
  0x26   : > { %s3307_s16 = scalar_select %p392_p1, %s3143_s0, %s394_s15  }
  0x28   : > { %3771 = sst [smem:[#allocation19_spill]] %s3307_s16 }
  0x2a   : > { %s3746_s17 = sand.u32 1, %s3139_s19   ;;  %p615_p2 = scmp.lt.s32.totalorder %s3147_s20, 1 }
  0x2b   : > { %s2574_s23 = sshll.u32 %s3746_s17, 4  ;;  %s3773_s4 = sld [smem:[#allocation22_spill]] }
  0x2c   : > { %s3314_s24 = scalar_select %p615_p2, %s3147_s20, 1 }
  0x2d   : > { %s3774_s6 = sld [smem:[#allocation23_spill]]  ;;  %s3370_s16 = scalar_lea.vmem [#allocation6], %s2574_s23 }
  0x2e   : > { %s2655_s17 = sshll.u32 %s3314_s24, 4  ;;  %s639_s3 = scalar_lea.vmem %s3737_s8, %s3314_s24 }
  0x2f   : > { %s642_s29 = scalar_lea.vmem %s3738_s9, %s3314_s24  ;;  %s658_s0 = scalar_lea.vmem %s3742_s13, %s3314_s24 }
  0x30   : > { %p2583_p3 = scmp.ne.s32.totalorder %s3147_s20, 0 }
  0x31   : > { %s3332_s18 = scalar_lea.vmem %s3773_s4, %s2655_s17  ;;  %s3354_s4 = scalar_lea.vmem %s3739_s10, %s2655_s17 }
  0x32   : > { %665 = sbr.rel (%p2583_p3) target bundleno = 58 (0x3a), region = 76 }
  0x33   : > { %s3337_s19 = scalar_lea.vmem %s3774_s6, %s2655_s17  ;;  %s650_s6 = scalar_lea.vmem %s3740_s11, %s3314_s24 }
  0x34   : > { %3775 = sst [smem:[#allocation20_spill]] %s3337_s19  ;;  %s2658_s19 = sshll.u32 %s3314_s24, 6 }
  0x35   : > { %s3364_s28 = scalar_lea.vmem %s3741_s12, %s2658_s19 }
  0x37   : > { %v666_v0 = vld [vmem:[%s3730_s1] sm:$0xff]  ;;  %vm670_vm0 = vcmask 261120   ;;  %v667_v1 = vld [vmem:[%s3730_s1 + $0x8] sm:$0xff]  ;;  %v668_v2 = vld [vmem:[%s3730_s1 + $0x10] sm:$0xff] }
  0x38   : > { %671 = vst.msk [vmem:[#allocation2] sm:$0xff] %vm670_vm0, %v666_v0  ;;  %672 = vst.msk [vmem:[#allocation2 + $0x8] sm:$0xff] %vm670_vm0, %v667_v1  ;;  %v669_v3 = vld [vmem:[%s3730_s1 + $0x18] sm:$0xff] }
  0x39   : > { %673 = vst.msk [vmem:[#allocation2 + $0x10] sm:$0xff] %vm670_vm0, %v668_v2  ;;  %674 = vst.msk [vmem:[#allocation2 + $0x18] sm:$0xff] %vm670_vm0, %v669_v3 }
  0x3a PF: > { %vm681_vm1 = vcmask 261120   ;;  %v2949_v32 = vld [vmem:[%s3332_s18 + $0x8] sm:$0xff]   ;;  %v2950_v33 = vld [vmem:[%s3332_s18] sm:$0xff]   ;;  %s3776_s15 = scalar_lea.vmem %s3731_s2, %s3314_s24  ;;  %s3777_s21 = sld [smem:[#allocation21_spill]]  ;;  %v3158_v2 = vmov 0.0   ;;  %vm3159_vm2 = vmmov 0  }
  0x3b   : > { %2734 = vmatprep.subr.bf16.mxu0 %v2949_v32  ;;  %v2584_v48 = vld [vmem:[%s3776_s15] ss:$0 sm:$0xff]  ;;  %2754 = vmatprep.subr.bf16.mxu1 %v3158_v2  ;;  %s3779_s22 = scalar_lea.vmem %s3734_s5, %s3314_s24  ;;  %s3160_s23 = smov 96   ;;  %vm846_vm3 = vcmask 64512   ;;  %vm944_vm4 = vcmask 130048   ;;  %vm1101_vm5 = vcmask 60416  }
  0x3c   : > { %2735 = vmatpush3.bf16.msra.mxu0 %v2949_v32  ;;  %2756 = vmatprep.mubr.msk.bf16.mxu1 %vm3159_vm2, %v3158_v2  ;;  %s3161_s27 = smov 64   ;;  %s3162_s18 = smov 88   ;;  %vm1374_vm6 = vcmask 126016   ;;  %vm1645_vm7 = vcmask 191616   ;;  %vm1916_vm8 = vcmask 257216   ;;  %vm2349_vm9 = vcmask 257024  }
  0x3d   : > { %2736 = vmatprep.subr.bf16.mxu0 %v2950_v33  ;;  %s3163_s26 = smov 120   ;;  %s3164_s15 = smov 56  }
  0x3e   : > { %s3165_s30 = smov 80   ;;  %s3166_s17 = smov 112  }
  0x3f   : > { %v675_v4 = vld [vmem:[#allocation2] sm:$0xff]  ;;  %v676_v6 = vld [vmem:[#allocation2 + $0x8] sm:$0xff]  ;;  %s3169_s14 = smov 104   ;;  %s3170_s19 = smov 40  }
  0x40   : > { %v677_v5 = vld [vmem:[#allocation2 + $0x10] sm:$0xff]  ;;  %v682_v7 = vsel %vm681_vm1, %v675_v4, 0.0  ;;  %v678_v9 = vld [vmem:[#allocation2 + $0x18] sm:$0xff]  ;;  %v685_v10 = vsel %vm681_vm1, %v676_v6, 0.0  ;;  %2737 = vmatpush3.bf16.msra.mxu0 %v2950_v33  ;;  %s3778_s25 = scalar_lea.vmem %s3777_s21, %s3314_s24  ;;  %s3167_s21 = smov 48  }
  0x41   : > { %v688_v8 = vsel %vm681_vm1, %v677_v5, 0.0  ;;  %683 = vadd.xlane.f32.xlu0 %v682_v7  ;;  %v691_v11 = vsel %vm681_vm1, %v678_v9, 0.0  ;;  %v2585_v53 = vld [vmem:[%s3778_s25] ss:$0 sm:$0xff]  ;;  %2742 = vmatprep.subr.bf16.mxu0 %v3158_v2  ;;  %s3168_s25 = smov 72   ;;  %s3797_s20 = smov (!%p3292_p8, %s3147_s20), 0 }
  0x42   : > { %689 = vadd.xlane.f32.xlu1 %v688_v8 }
  0x45   : > { %686 = vadd.xlane.f32.xlu0 %v685_v10 }
  0x46   : > { %692 = vadd.xlane.f32.xlu1 %v691_v11 }
  0xca   : > { %v684_v12 = vpop.xlane.xlu0 %683 }
  0xcb   : > { %v690_v13 = vpop.xlane.xlu1 %689  ;;  %v695_v14 = vmul.f32 0.03125, %v684_v12 }
  0xcc   : > { %v697_v15 = vmul.f32 0.03125, %v690_v13 }
  0xcd   : > { %v699_v16 = vsub.f32 %v675_v4, %v695_v14  ;;  %v2586_v4 = vld [vmem:[%s3779_s22] ss:$0 sm:$0xff]  ;;  %s3171_s22 = smov 8  }
  0xce   : > { %v701_v17 = vsub.f32 %v677_v5, %v697_v15  ;;  %v687_v18 = vpop.xlane.xlu0 %686 }
  0xcf   : > { %v693_v19 = vpop.xlane.xlu1 %692  ;;  %v696_v20 = vmul.f32 0.03125, %v687_v18  ;;  %v703_v22 = vmul.f32 %v699_v16, %v699_v16 }
  0xd0   : > { %v698_v21 = vmul.f32 0.03125, %v693_v19  ;;  %v705_v23 = vmul.f32 %v701_v17, %v701_v17 }
  0xd1   : > { %v700_v24 = vsub.f32 %v676_v6, %v696_v20  ;;  %v707_v26 = vsel %vm681_vm1, %v703_v22, 0.0 }
  0xd2   : > { %v702_v25 = vsub.f32 %v678_v9, %v698_v21  ;;  %708 = vadd.xlane.f32.xlu0 %v707_v26  ;;  %v713_v27 = vsel %vm681_vm1, %v705_v23, 0.0 }
  0xd3   : > { %v704_v28 = vmul.f32 %v700_v24, %v700_v24 }
  0xd4   : > { %v706_v29 = vmul.f32 %v702_v25, %v702_v25 }
  0xd5   : > { %v710_v30 = vsel %vm681_vm1, %v704_v28, 0.0 }
  0xd6   : > { %714 = vadd.xlane.f32.xlu0 %v713_v27  ;;  %711 = vadd.xlane.f32.xlu1 %v710_v30  ;;  %v716_v31 = vsel %vm681_vm1, %v706_v29, 0.0 }
  0xda   : > { %717 = vadd.xlane.f32.xlu1 %v716_v31 }
 0x15b   : > { %v709_v34 = vpop.xlane.xlu0 %708 }
 0x15c   : > { %v719_v35 = vmul.f32 0.03125, %v709_v34 }
 0x15e   : > { %v723_v36 = vadd.f32 1e-05, %v719_v35 }
 0x15f   : > { %v712_v37 = vpop.xlane.xlu1 %711  ;;  %v715_v38 = vpop.xlane.xlu0 %714 }
 0x160   : > { %2965 = vrsqrt.f32 %v723_v36  ;;  %v720_v39 = vmul.f32 0.03125, %v712_v37  ;;  %v721_v40 = vmul.f32 0.03125, %v715_v38 }
 0x162   : > { %v724_v41 = vadd.f32 1e-05, %v720_v39  ;;  %v725_v42 = vadd.f32 1e-05, %v721_v40 }
 0x163   : > { %v718_v43 = vpop.xlane.xlu1 %717 }
 0x164   : > { %2967 = vrsqrt.f32 %v724_v41  ;;  %v722_v44 = vmul.f32 0.03125, %v718_v43 }
 0x165   : > { %2969 = vrsqrt.f32 %v725_v42 }
 0x166   : > { %v726_v45 = vadd.f32 1e-05, %v722_v44 }
 0x168   : > { %2971 = vrsqrt.f32 %v726_v45 }
 0x16d   : > { %v2966_v46 = vpop.eup %2965 }
 0x16e   : > { %v731_v47 = vmul.f32 %v2966_v46, %v699_v16 }
 0x170   : > { %v741_v52 = vmul.f32 %v2584_v48, %v731_v47 }
 0x171   : > { %v2968_v49 = vpop.eup %2967 }
 0x172   : > { %v2970_v50 = vpop.eup %2969  ;;  %v732_v51 = vmul.f32 %v2968_v49, %v700_v24  ;;  %v751_v57 = vadd.f32 %v2585_v53, %v741_v52 }
 0x173   : > { %v733_v54 = vmul.f32 %v2970_v50, %v701_v17 }
 0x174   : > { %v742_v55 = vmul.f32 %v2584_v48, %v732_v51 }
 0x175   : > { %v2972_v56 = vpop.eup %2971  ;;  %v743_v60 = vmul.f32 %v2584_v48, %v733_v54 }
 0x176   : > { %v752_v58 = vadd.f32 %v2585_v53, %v742_v55  ;;  %v734_v59 = vmul.f32 %v2972_v56, %v702_v25 }
 0x177   : > { %v753_v63 = vadd.f32 %v2585_v53, %v743_v60 }
 0x178   : > { %v755_v61 = vpack.c.bf16 %v752_v58, %v751_v57  ;;  %v744_v62 = vmul.f32 %v2584_v48, %v734_v59 }
 0x17a   : > { %2738 = vmatprep.mubr.msk.bf16.mxu0 %vm681_vm1, %v755_v61  ;;  %v754_v0 = vadd.f32 %v2585_v53, %v744_v62 }
 0x17c   : > { %v756_v1 = vpack.c.bf16 %v754_v0, %v753_v63 }
 0x17e   : > { %2739 = vmatmul.mubr.msk.bf16.vlgmr.msra.gmra.mxu0 %vm681_vm1, %v756_v1 }
 0x17f   : > { %2744 = vmatprep.mubr.msk.bf16.mxu0 %vm3159_vm2, %v3158_v2 }
 0x23e   : > { %v2740_v3 = vpop.f32.mrf.mxu0 }
 0x23f   : > { %v829_v6 = vadd.f32 %v2740_v3, %v2586_v4 }
 0x240   : > { %v820_v5 = vpop.f32.mrf.mxu0 }
 0x241   : > { %v821_v8 = vadd.f32 %v2586_v4, %v820_v5  ;;  %v837_v11 = vmul.f32 0.35355338, %v829_v6 }
 0x242   : > { %v2741_v7 = vpop.f32.mrf.mxu0 }
 0x243   : > { %v832_v9 = vadd.f32 %v2741_v7, %v2586_v4  ;;  %v835_v15 = vmul.f32 0.35355338, %v821_v8 }
 0x244   : > { %v823_v10 = vpop.f32.mrf.mxu0 }
 0x245   : > { %v838_v12 = vmul.f32 0.35355338, %v832_v9  ;;  %v3418_v13 = vpack.c.bf16 %v832_v9, %v829_v6  ;;  %v824_v14 = vadd.f32 %v2586_v4, %v823_v10 }
 0x247   : > { %v3420_v16 = vpack.c.bf16 %v838_v12, %v837_v11  ;;  %v836_v17 = vmul.f32 0.35355338, %v824_v14  ;;  %v3422_v18 = vpack.c.bf16 %v824_v14, %v821_v8  ;;  %895 = vrot.lane.b32.xlu1 %v3418_v13, %s3160_s23 }
 0x249   : > { %v3425_v19 = vpack.c.bf16 %v836_v17, %v835_v15  ;;  %844 = vrot.lane.b32.xlu0 %v3422_v18, %s3160_s23  ;;  %s3172_s23 = smov 16  }
 0x2b9   : > { %v896_v22 = vpop.permute.xlu1 %895 }
 0x2ba   : > { %v901_v23 = vsel %vm846_vm3, %v896_v22, 0 }
 0x2bb   : > { %v845_v20 = vpop.permute.xlu0 %844 }
 0x2bc   : > { %v851_v21 = vsel %vm846_vm3, %v845_v20, 0 }
 0x2bd   : > { %2743 = vmatpush3.bf16.xpose.msra.mxu0 %v851_v21 }
 0x2be   : > { %2748 = vmatprep.subr.bf16.mxu0 %v3158_v2 }
 0x2c4   : > { %2745 = vmatmul.mubr.msk.bf16.vlgmr.msra.gmra.mxu0 %vm846_vm3, %v3425_v19 }
 0x2c5   : > { %2749 = vmatpush3.bf16.xpose.msra.mxu0 %v901_v23  ;;  %2750 = vmatprep.mubr.msk.bf16.mxu0 %vm3159_vm2, %v3158_v2 }
 0x2c6   : > { %2760 = vmatprep.subr.bf16.mxu0 %v3158_v2 }
 0x2cc   : > { %2751 = vmatmul.mubr.msk.bf16.vlgmr.msra.gmra.mxu0 %vm846_vm3, %v3420_v16 }
 0x2cd   : > { %2762 = vmatprep.mubr.msk.bf16.mxu0 %vm3159_vm2, %v3158_v2 }
 0x384   : > { %v887_v24 = vpop.f32.mrf.mxu0 }
 0x385   : > { %v945_v25 = vsel %vm944_vm4, %v887_v24, -inf }
 0x386   : > { %946 = vmax.xlane.f32.xlu1 %v945_v25  ;;  %v2746_v26 = vpop.f32.mrf.mxu0 }
 0x388   : > { %v890_v27 = vpop.f32.mrf.mxu0 }
 0x389   : > { %v948_v28 = vsel %vm944_vm4, %v890_v27, -inf }
 0x38a   : > { %949 = vmax.xlane.f32.xlu0 %v948_v28  ;;  %v2747_v29 = vpop.f32.mrf.mxu0 }
 0x38c   : > { %v937_v30 = vpop.f32.mrf.mxu0 }
 0x38d   : > { %v951_v31 = vsel %vm944_vm4, %v937_v30, -inf }
 0x38e   : > { %952 = vmax.xlane.f32.xlu0 %v951_v31  ;;  %v2752_v32 = vpop.f32.mrf.mxu0 }
 0x390   : > { %v940_v33 = vpop.f32.mrf.mxu0 }
 0x391   : > { %v954_v34 = vsel %vm944_vm4, %v940_v33, -inf }
 0x392   : > { %955 = vmax.xlane.f32.xlu1 %v954_v34  ;;  %v2753_v35 = vpop.f32.mrf.mxu0 }
 0x40f   : > { %v947_v36 = vpop.xlane.xlu1 %946 }
 0x410   : > { %v957_v37 = vsub.f32 %v887_v24, %v947_v36 }
 0x412   : > { %v961_v38 = vmul.f32 1.442695, %v957_v37 }
 0x413   : > { %v950_v39 = vpop.xlane.xlu0 %949 }
 0x414   : > { %2973 = vpow2.f32 %v961_v38  ;;  %v958_v40 = vsub.f32 %v890_v27, %v950_v39 }
 0x416   : > { %v963_v41 = vmul.f32 1.442695, %v958_v40 }
 0x417   : > { %v953_v42 = vpop.xlane.xlu0 %952 }
 0x418   : > { %2975 = vpow2.f32 %v963_v41  ;;  %v959_v43 = vsub.f32 %v937_v30, %v953_v42 }
 0x41a   : > { %v965_v44 = vmul.f32 1.442695, %v959_v43 }
 0x41b   : > { %v956_v51 = vpop.xlane.xlu1 %955 }
 0x41c   : > { %2977 = vpow2.f32 %v965_v44  ;;  %v960_v52 = vsub.f32 %v940_v33, %v956_v51 }
 0x41e   : > { %v967_v53 = vmul.f32 1.442695, %v960_v52 }
 0x420   : > { %2979 = vpow2.f32 %v967_v53 }
 0x421   : > { %v2974_v45 = vpop.eup %2973 }
 0x422   : > { %v969_v46 = vsel %vm944_vm4, %v2974_v45, 0.0 }
 0x423   : > { %970 = vadd.xlane.f32.xlu0 %v969_v46 }
 0x425   : > { %v2976_v47 = vpop.eup %2975 }
 0x426   : > { %v972_v48 = vsel %vm944_vm4, %v2976_v47, 0.0 }
 0x427   : > { %973 = vadd.xlane.f32.xlu1 %v972_v48 }
 0x429   : > { %v2978_v49 = vpop.eup %2977 }
 0x42a   : > { %v975_v50 = vsel %vm944_vm4, %v2978_v49, 0.0 }
 0x42b   : > { %976 = vadd.xlane.f32.xlu0 %v975_v50 }
 0x42d   : > { %v2980_v54 = vpop.eup %2979 }
 0x42e   : > { %v978_v55 = vsel %vm944_vm4, %v2980_v54, 0.0 }
 0x438   : > { %1038 = vrot.lane.b32.xlu1 %v3418_v13, %s3161_s27 }
 0x43c   : > { %1109 = vrot.lane.b32.xlu1 %v3422_v18, %s3162_s18 }
 0x441   : > { %991 = vrot.lane.b32.xlu0 %v3422_v18, %s3161_s27 }
 0x445   : > { %1107 = vrot.lane.b32.xlu0 %v3425_v19, %s3163_s26 }
 0x460   : > { %979 = vadd.xlane.f32.xlu1 %v978_v55 }
 0x471   : > { %1161 = vrot.lane.b32.xlu1 %v3418_v13, %s3162_s18  ;;  %s3780_s18 = sld [smem:[#allocation20_spill]] }
 0x475   : > { %1159 = vrot.lane.b32.xlu1 %v3420_v16, %s3163_s26  ;;  %s3173_s26 = smov 24  }
 0x4ac   : > { %v971_v56 = vpop.xlane.xlu0 %970 }
 0x4ad   : > { %2981 = vrcp.f32 %v971_v56 }
 0x4b0   : > { %v974_v57 = vpop.xlane.xlu1 %973 }
 0x4b1   : > { %2983 = vrcp.f32 %v974_v57 }
 0x4b4   : > { %v977_v58 = vpop.xlane.xlu0 %976  ;;  %v1039_v59 = vpop.permute.xlu1 %1038 }
 0x4b5   : > { %2761 = vmatpush3.bf16.msra.mxu0 %v1039_v59  ;;  %2985 = vrcp.f32 %v977_v58 }
 0x4b6   : > { %2772 = vmatprep.subr.bf16.mxu0 %v3158_v2 }
 0x4b8   : > { %v992_v60 = vpop.permute.xlu0 %991  ;;  %v1110_v1 = vpop.permute.xlu1 %1109 }
 0x4b9   : > { %2755 = vmatpush3.bf16.msra.mxu1 %v992_v60  ;;  %v1115_v4 = vsel %vm846_vm3, %v1110_v1, 0 }
 0x4ba   : > { %2766 = vmatprep.subr.bf16.mxu1 %v3158_v2  ;;  %v2982_v61 = vpop.eup %2981 }
 0x4bb   : > { %v985_v63 = vmul.f32 %v2982_v61, %v2974_v45 }
 0x4bc   : > { %v1108_v5 = vpop.permute.xlu0 %1107 }
 0x4be   : > { %v2984_v62 = vpop.eup %2983 }
 0x4bf   : > { %v986_v0 = vmul.f32 %v2984_v62, %v2976_v47 }
 0x4c1   : > { %v989_v3 = vpack.c.bf16 %v986_v0, %v985_v63 }
 0x4c2   : > { %v2986_v7 = vpop.eup %2985 }
 0x4c3   : > { %2757 = vmatmul.mubr.msk.bf16.vlgmr.msra.gmra.mxu1 %vm944_vm4, %v989_v3  ;;  %v987_v9 = vmul.f32 %v2986_v7, %v2978_v49 }
 0x4c4   : > { %2767 = vmatpush3.bf16.xpose.msra.mxu1 %v1115_v4  ;;  %2768 = vmatprep.mubr.msk.bf16.mxu1 %vm3159_vm2, %v3158_v2 }
 0x4c5   : > { %2778 = vmatprep.subr.bf16.mxu1 %v3158_v2 }
 0x4cb   : > { %2769 = vmatmul.mubr.msk.bf16.vlgmr.msra.gmra.mxu1 %vm846_vm3, %v1108_v5 }
 0x4cc   : > { %2780 = vmatprep.mubr.msk.bf16.mxu1 %vm3159_vm2, %v3158_v2 }
 0x4e9   : > { %v980_v6 = vpop.xlane.xlu1 %979 }
 0x4ea   : > { %2987 = vrcp.f32 %v980_v6 }
 0x4ed   : > { %v1162_v11 = vpop.permute.xlu1 %1161 }
 0x4ee   : > { %v1167_v14 = vsel %vm846_vm3, %v1162_v11, 0 }
 0x4f1   : > { %v1160_v15 = vpop.permute.xlu1 %1159 }
 0x4f7   : > { %v2988_v8 = vpop.eup %2987 }
 0x4f8   : > { %v988_v10 = vmul.f32 %v2988_v8, %v2980_v54 }
 0x4fa   : > { %v990_v12 = vpack.c.bf16 %v988_v10, %v987_v9 }
 0x4fc   : > { %2763 = vmatmul.mubr.msk.bf16.vlgmr.msra.gmra.mxu0 %vm944_vm4, %v990_v12 }
 0x4fd   : > { %2773 = vmatpush3.bf16.xpose.msra.mxu0 %v1167_v14  ;;  %2774 = vmatprep.mubr.msk.bf16.mxu0 %vm3159_vm2, %v3158_v2 }
 0x4fe   : > { %2784 = vmatprep.subr.bf16.mxu0 %v3158_v2 }
 0x504   : > { %2775 = vmatmul.mubr.msk.bf16.vlgmr.msra.gmra.mxu0 %vm846_vm3, %v1160_v15 }
 0x505   : > { %2786 = vmatprep.mubr.msk.bf16.mxu0 %vm3159_vm2, %v3158_v2 }
 0x583   : > { %v1031_v17 = vpop.f32.mrf.mxu1 }
 0x584   : > { %v2659_v20 = vpack.c.bf16 %v1031_v17, %v1031_v17 }
 0x585   : > { %v2758_v21 = vpop.f32.mrf.mxu1 }
 0x586   : > { %1102 = vst.msk [vmem:[#allocation3] sm:$0xf] %vm1101_vm5, %v2659_v20 }
 0x587   : > { %v1034_v22 = vpop.f32.mrf.mxu1 }
 0x588   : > { %v2660_v23 = vpack.c.bf16 %v1034_v22, %v1034_v22 }
 0x589   : > { %v2759_v24 = vpop.f32.mrf.mxu1 }
 0x58a   : > { %1103 = vst.msk [vmem:[#allocation3 + $0x4] sm:$0xf] %vm1101_vm5, %v2660_v23 }
 0x58b   : > { %v1151_v25 = vpop.f32.mrf.mxu1 }
 0x58c   : > { %v1210_v26 = vsel %vm944_vm4, %v1151_v25, -inf }
 0x58d   : > { %1211 = vmax.xlane.f32.xlu0 %v1210_v26  ;;  %v2770_v27 = vpop.f32.mrf.mxu1 }
 0x58f   : > { %v1154_v28 = vpop.f32.mrf.mxu1 }
 0x590   : > { %v1213_v29 = vsel %vm944_vm4, %v1154_v28, -inf }
 0x591   : > { %1214 = vmax.xlane.f32.xlu1 %v1213_v29  ;;  %v2771_v30 = vpop.f32.mrf.mxu1 }
 0x5bc   : > { %v1078_v31 = vpop.f32.mrf.mxu0 }
 0x5bd   : > { %v2661_v32 = vpack.c.bf16 %v1078_v31, %v1078_v31 }
 0x5be   : > { %v2764_v33 = vpop.f32.mrf.mxu0 }
 0x5bf   : > { %1104 = vst.msk [vmem:[#allocation3 + $0x8] sm:$0xf] %vm1101_vm5, %v2661_v32 }
 0x5c0   : > { %v1081_v34 = vpop.f32.mrf.mxu0 }
 0x5c1   : > { %v2662_v35 = vpack.c.bf16 %v1081_v34, %v1081_v34 }
 0x5c2   : > { %v2765_v36 = vpop.f32.mrf.mxu0 }
 0x5c3   : > { %1105 = vst.msk [vmem:[#allocation3 + $0xc] sm:$0xf] %vm1101_vm5, %v2662_v35 }
 0x5c4   : > { %v1203_v37 = vpop.f32.mrf.mxu0 }
 0x5c5   : > { %v1216_v38 = vsel %vm944_vm4, %v1203_v37, -inf }
 0x5c6   : > { %1217 = vmax.xlane.f32.xlu0 %v1216_v38  ;;  %v2776_v39 = vpop.f32.mrf.mxu0 }
 0x5c8   : > { %v1206_v40 = vpop.f32.mrf.mxu0 }
 0x5c9   : > { %v1219_v41 = vsel %vm944_vm4, %v1206_v40, -inf }
 0x5ca   : > { %1220 = vmax.xlane.f32.xlu0 %v1219_v41  ;;  %v2777_v42 = vpop.f32.mrf.mxu0 }
 0x616   : > { %v1212_v43 = vpop.xlane.xlu0 %1211 }
 0x617   : > { %v1222_v44 = vsub.f32 %v1151_v25, %v1212_v43 }
 0x619   : > { %v1226_v45 = vmul.f32 1.442695, %v1222_v44 }
 0x61a   : > { %v1215_v46 = vpop.xlane.xlu1 %1214 }
 0x61b   : > { %2989 = vpow2.f32 %v1226_v45  ;;  %v1223_v47 = vsub.f32 %v1154_v28, %v1215_v46 }
 0x61d   : > { %v1228_v48 = vmul.f32 1.442695, %v1223_v47 }
 0x61f   : > { %2991 = vpow2.f32 %v1228_v48 }
 0x628   : > { %v2990_v49 = vpop.eup %2989 }
 0x629   : > { %v1234_v50 = vsel %vm944_vm4, %v2990_v49, 0.0 }
 0x62a   : > { %1235 = vadd.xlane.f32.xlu0 %v1234_v50 }
 0x62c   : > { %v2992_v51 = vpop.eup %2991 }
 0x62d   : > { %v1237_v52 = vsel %vm944_vm4, %v2992_v51, 0.0 }
 0x62e   : > { %1238 = vadd.xlane.f32.xlu1 %v1237_v52 }
 0x63f   : > { %1303 = vrot.lane.b32.xlu1 %v3418_v13, %s3164_s15 }
 0x643   : > { %1381 = vrot.lane.b32.xlu1 %v3422_v18, %s3165_s30 }
 0x64f   : > { %v1218_v53 = vpop.xlane.xlu0 %1217 }
 0x650   : > { %v1224_v54 = vsub.f32 %v1203_v37, %v1218_v53 }
 0x652   : > { %v1230_v55 = vmul.f32 1.442695, %v1224_v54 }
 0x653   : > { %v1221_v56 = vpop.xlane.xlu0 %1220 }
 0x654   : > { %2993 = vpow2.f32 %v1230_v55  ;;  %v1225_v57 = vsub.f32 %v1206_v40, %v1221_v56 }
 0x656   : > { %v1232_v58 = vmul.f32 1.442695, %v1225_v57 }
 0x658   : > { %2995 = vpow2.f32 %v1232_v58 }
 0x661   : > { %v2994_v59 = vpop.eup %2993 }
 0x662   : > { %v1240_v60 = vsel %vm944_vm4, %v2994_v59, 0.0 }
 0x663   : > { %1241 = vadd.xlane.f32.xlu0 %v1240_v60 }
 0x665   : > { %v2996_v61 = vpop.eup %2995 }
 0x666   : > { %v1243_v62 = vsel %vm944_vm4, %v2996_v61, 0.0 }
 0x667   : > { %1244 = vadd.xlane.f32.xlu1 %v1243_v62 }
 0x678   : > { %1432 = vrot.lane.b32.xlu1 %v3418_v13, %s3165_s30 }
 0x679   : > { %1256 = vrot.lane.b32.xlu0 %v3422_v18, %s3164_s15  ;;  %s3784_s15 = sld [smem:[#allocation24_spill]] }
 0x67c   : > { %1430 = vrot.lane.b32.xlu1 %v3420_v16, %s3166_s17 }
 0x67d   : > { %1379 = vrot.lane.b32.xlu0 %v3425_v19, %s3166_s17  ;;  %s3781_s17 = scalar_lea.vmem %s3736_s7, %s3314_s24  ;;  %s2372_s24 = sshll.u32 %s3370_s16, 4  ;;  %s3668_s24 = int_to_ptr.vmem [resolvable:$true] %s2372_s24 }
 0x6b3   : > { %v1236_v1 = vpop.xlane.xlu0 %1235 }
 0x6b7   : > { %v1239_v63 = vpop.xlane.xlu1 %1238 }
 0x6b8   : > { %2997 = vrcp.f32 %v1239_v63 }
 0x6b9   : > { %2999 = vrcp.f32 %v1236_v1 }
 0x6bb   : > { %v1304_v0 = vpop.permute.xlu1 %1303 }
 0x6bc   : > { %2785 = vmatpush3.bf16.msra.mxu0 %v1304_v0 }
 0x6bd   : > { %2796 = vmatprep.subr.bf16.mxu0 %v3158_v2 }
 0x6bf   : > { %v1382_v4 = vpop.permute.xlu1 %1381 }
 0x6c0   : > { %v1387_v12 = vsel %vm846_vm3, %v1382_v4, 0 }
 0x6c5   : > { %v2998_v3 = vpop.eup %2997 }
 0x6c6   : > { %v3000_v6 = vpop.eup %2999  ;;  %v1251_v7 = vmul.f32 %v2998_v3, %v2992_v51 }
 0x6c7   : > { %v1250_v10 = vmul.f32 %v3000_v6, %v2990_v49 }
 0x6c9   : > { %v1254_v11 = vpack.c.bf16 %v1251_v7, %v1250_v10 }
 0x6ec   : > { %v1242_v5 = vpop.xlane.xlu0 %1241 }
 0x6ed   : > { %3001 = vrcp.f32 %v1242_v5 }
 0x6f0   : > { %v1245_v8 = vpop.xlane.xlu1 %1244  ;;  %v1257_v9 = vpop.permute.xlu0 %1256 }
 0x6f1   : > { %3003 = vrcp.f32 %v1245_v8  ;;  %2779 = vmatpush3.bf16.msra.mxu1 %v1257_v9 }
 0x6f2   : > { %2790 = vmatprep.subr.bf16.mxu1 %v3158_v2 }
 0x6f4   : > { %2781 = vmatmul.mubr.msk.bf16.vlgmr.msra.gmra.mxu1 %vm944_vm4, %v1254_v11  ;;  %v1380_v14 = vpop.permute.xlu0 %1379  ;;  %v1433_v22 = vpop.permute.xlu1 %1432 }
 0x6f5   : > { %2791 = vmatpush3.bf16.xpose.msra.mxu1 %v1387_v12  ;;  %2792 = vmatprep.mubr.msk.bf16.mxu1 %vm3159_vm2, %v3158_v2  ;;  %v1438_v24 = vsel %vm846_vm3, %v1433_v22, 0 }
 0x6f6   : > { %2802 = vmatprep.subr.bf16.mxu1 %v3158_v2 }
 0x6f8   : > { %v1431_v25 = vpop.permute.xlu1 %1430 }
 0x6fa   : > { %v3002_v15 = vpop.eup %3001 }
 0x6fb   : > { %v1252_v20 = vmul.f32 %v3002_v15, %v2994_v59 }
 0x6fc   : > { %2793 = vmatmul.mubr.msk.bf16.vlgmr.msra.gmra.mxu1 %vm846_vm3, %v1380_v14 }
 0x6fd   : > { %2804 = vmatprep.mubr.msk.bf16.mxu1 %vm3159_vm2, %v3158_v2 }
 0x6fe   : > { %v3004_v17 = vpop.eup %3003 }
 0x6ff   : > { %v1253_v21 = vmul.f32 %v3004_v17, %v2996_v61 }
 0x701   : > { %v1255_v23 = vpack.c.bf16 %v1253_v21, %v1252_v20 }
 0x703   : > { %2787 = vmatmul.mubr.msk.bf16.vlgmr.msra.gmra.mxu0 %vm944_vm4, %v1255_v23 }
 0x704   : > { %2797 = vmatpush3.bf16.xpose.msra.mxu0 %v1438_v24  ;;  %2798 = vmatprep.mubr.msk.bf16.mxu0 %vm3159_vm2, %v3158_v2 }
 0x705   : > { %2808 = vmatprep.subr.bf16.mxu0 %v3158_v2 }
 0x70b   : > { %2799 = vmatmul.mubr.msk.bf16.vlgmr.msra.gmra.mxu0 %vm846_vm3, %v1431_v25 }
 0x70c   : > { %2810 = vmatprep.mubr.msk.bf16.mxu0 %vm3159_vm2, %v3158_v2 }
 0x7b4   : > { %v3510_v26 = vpop.f32.mrf.mxu1 }
 0x7b6   : > { %v2782_v27 = vpop.f32.mrf.mxu1 }
 0x7b8   : > { %v3512_v28 = vpop.f32.mrf.mxu1 }
 0x7ba   : > { %v2783_v29 = vpop.f32.mrf.mxu1 }
 0x7bc   : > { %v1423_v30 = vpop.f32.mrf.mxu1 }
 0x7bd   : > { %v1481_v31 = vsel %vm944_vm4, %v1423_v30, -inf }
 0x7be   : > { %1482 = vmax.xlane.f32.xlu0 %v1481_v31  ;;  %v2794_v32 = vpop.f32.mrf.mxu1 }
 0x7c0   : > { %v1426_v33 = vpop.f32.mrf.mxu1 }
 0x7c1   : > { %v1484_v34 = vsel %vm944_vm4, %v1426_v33, -inf }
 0x7c2   : > { %1485 = vmax.xlane.f32.xlu1 %v1484_v34  ;;  %v2795_v35 = vpop.f32.mrf.mxu1 }
 0x7c3   : > { %v3516_v36 = vpop.f32.mrf.mxu0 }
 0x7c5   : > { %v2788_v37 = vpop.f32.mrf.mxu0 }
 0x7c7   : > { %v3518_v38 = vpop.f32.mrf.mxu0 }
 0x7c9   : > { %v2789_v39 = vpop.f32.mrf.mxu0 }
 0x7cb   : > { %v1474_v40 = vpop.f32.mrf.mxu0 }
 0x7cc   : > { %v1487_v41 = vsel %vm944_vm4, %v1474_v40, -inf }
 0x7cd   : > { %1488 = vmax.xlane.f32.xlu0 %v1487_v41  ;;  %v2800_v42 = vpop.f32.mrf.mxu0 }
 0x7cf   : > { %v1477_v43 = vpop.f32.mrf.mxu0 }
 0x7d0   : > { %v1490_v44 = vsel %vm944_vm4, %v1477_v43, -inf }
 0x7d1   : > { %1491 = vmax.xlane.f32.xlu0 %v1490_v44  ;;  %v2801_v45 = vpop.f32.mrf.mxu0 }
 0x847   : > { %v1483_v46 = vpop.xlane.xlu0 %1482 }
 0x848   : > { %v1493_v47 = vsub.f32 %v1423_v30, %v1483_v46 }
 0x84a   : > { %v1497_v48 = vmul.f32 1.442695, %v1493_v47 }
 0x84b   : > { %v1486_v49 = vpop.xlane.xlu1 %1485 }
 0x84c   : > { %3005 = vpow2.f32 %v1497_v48  ;;  %v1494_v50 = vsub.f32 %v1426_v33, %v1486_v49 }
 0x84e   : > { %v1499_v51 = vmul.f32 1.442695, %v1494_v50 }
 0x850   : > { %3007 = vpow2.f32 %v1499_v51 }
 0x856   : > { %v1489_v52 = vpop.xlane.xlu0 %1488 }
 0x857   : > { %v1495_v53 = vsub.f32 %v1474_v40, %v1489_v52 }
 0x859   : > { %v3006_v54 = vpop.eup %3005  ;;  %v1501_v55 = vmul.f32 1.442695, %v1495_v53 }
 0x85a   : > { %v1505_v56 = vsel %vm944_vm4, %v3006_v54, 0.0  ;;  %v1492_v61 = vpop.xlane.xlu0 %1491 }
 0x85b   : > { %3009 = vpow2.f32 %v1501_v55  ;;  %1506 = vadd.xlane.f32.xlu0 %v1505_v56  ;;  %v1496_v62 = vsub.f32 %v1477_v43, %v1492_v61 }
 0x85d   : > { %v3008_v57 = vpop.eup %3007  ;;  %v1503_v63 = vmul.f32 1.442695, %v1496_v62 }
 0x85e   : > { %v1508_v58 = vsel %vm944_vm4, %v3008_v57, 0.0 }
 0x85f   : > { %1509 = vadd.xlane.f32.xlu1 %v1508_v58  ;;  %3011 = vpow2.f32 %v1503_v63 }
 0x868   : > { %v3010_v59 = vpop.eup %3009 }
 0x869   : > { %v1511_v60 = vsel %vm944_vm4, %v3010_v59, 0.0 }
 0x86a   : > { %1512 = vadd.xlane.f32.xlu0 %v1511_v60 }
 0x86c   : > { %v3012_v0 = vpop.eup %3011 }
 0x86d   : > { %v1514_v1 = vsel %vm944_vm4, %v3012_v0, 0.0 }
 0x870   : > { %1574 = vrot.lane.b32.xlu1 %v3418_v13, %s3167_s21 }
 0x874   : > { %1652 = vrot.lane.b32.xlu1 %v3422_v18, %s3168_s25 }
 0x880   : > { %1527 = vrot.lane.b32.xlu0 %v3422_v18, %s3167_s21  ;;  %s3077_s21 = scalar_lea.vmem %s3668_s24, 256 }
 0x881   : > { %p3078_p4 = scmp.ne.s32.totalorder %s3668_s24, %s3077_s21 }
 0x883   : > { %p3079_p5 = pnand %p3078_p4, %p3292_p8 }
 0x884   : > { %1650 = vrot.lane.b32.xlu0 %v3425_v19, %s3169_s14 }
 0x885   : > { %p3080_p6 = pneg %p3079_p5 }
 0x898   : > { %1515 = vadd.xlane.f32.xlu1 %v1514_v1 }
 0x8a9   : > { %1703 = vrot.lane.b32.xlu1 %v3418_v13, %s3168_s25  ;;  %s3174_s25 = smov [#allocation6]  }
 0x8ad   : > { %1701 = vrot.lane.b32.xlu1 %v3420_v16, %s3169_s14  ;;  %s3081_s14 = sshll.u32 %s3174_s25, 4  ;;  %s3082_s14 = int_to_ptr.vmem [resolvable:$false] %s3081_s14 }
 0x8ae   : > { %p3084_p7 = scmp.lt.s32.totalorder %s3668_s24, %s3082_s14 }
 0x8e4   : > { %v1507_v3 = vpop.xlane.xlu0 %1506 }
 0x8e5   : > { %3013 = vrcp.f32 %v1507_v3 }
 0x8e8   : > { %v1510_v4 = vpop.xlane.xlu1 %1509 }
 0x8e9   : > { %3015 = vrcp.f32 %v1510_v4 }
 0x8ec   : > { %v1575_v5 = vpop.permute.xlu1 %1574 }
 0x8ed   : > { %2809 = vmatpush3.bf16.msra.mxu0 %v1575_v5 }
 0x8ee   : > { %2820 = vmatprep.subr.bf16.mxu0 %v3158_v2 }
 0x8f0   : > { %v1653_v11 = vpop.permute.xlu1 %1652 }
 0x8f1   : > { %v1658_v16 = vsel %vm846_vm3, %v1653_v11, 0 }
 0x8f2   : > { %v3014_v7 = vpop.eup %3013 }
 0x8f3   : > { %v1513_v6 = vpop.xlane.xlu0 %1512  ;;  %v1521_v9 = vmul.f32 %v3014_v7, %v3006_v54  ;;  %v2663_v7 = vpack.c.bf16 %v3510_v26, %v3510_v26 }
 0x8f4   : > { %3017 = vrcp.f32 %v1513_v6 }
 0x8f6   : > { %v3016_v19 = vpop.eup %3015 }
 0x8f7   : > { %v1528_v8 = vpop.permute.xlu0 %1527  ;;  %v1522_v10 = vmul.f32 %v3016_v19, %v3008_v57  ;;  %v2665_v19 = vpack.c.bf16 %v3516_v36, %v3516_v36 }
 0x8f8   : > { %2803 = vmatpush3.bf16.msra.mxu1 %v1528_v8  ;;  %v2664_v8 = vpack.c.bf16 %v3512_v28, %v3512_v28 }
 0x8f9   : > { %v1525_v12 = vpack.c.bf16 %v1522_v10, %v1521_v9  ;;  %2814 = vmatprep.subr.bf16.mxu1 %v3158_v2 }
 0x8fb   : > { %2805 = vmatmul.mubr.msk.bf16.vlgmr.msra.gmra.mxu1 %vm944_vm4, %v1525_v12  ;;  %v1651_v14 = vpop.permute.xlu0 %1650 }
 0x8fc   : > { %2815 = vmatpush3.bf16.xpose.msra.mxu1 %v1658_v16  ;;  %2816 = vmatprep.mubr.msk.bf16.mxu1 %vm3159_vm2, %v3158_v2 }
 0x8fd   : > { %2826 = vmatprep.subr.bf16.mxu1 %v3158_v2 }
 0x901   : > { %v3018_v17 = vpop.eup %3017 }
 0x902   : > { %v1523_v21 = vmul.f32 %v3018_v17, %v3010_v59 }
 0x903   : > { %2817 = vmatmul.mubr.msk.bf16.vlgmr.msra.gmra.mxu1 %vm846_vm3, %v1651_v14 }
 0x904   : > { %2828 = vmatprep.mubr.msk.bf16.mxu1 %vm3159_vm2, %v3158_v2 }
 0x921   : > { %v1516_v15 = vpop.xlane.xlu1 %1515 }
 0x922   : > { %3019 = vrcp.f32 %v1516_v15 }
 0x925   : > { %v1704_v23 = vpop.permute.xlu1 %1703 }
 0x926   : > { %v1709_v25 = vsel %vm846_vm3, %v1704_v23, 0 }
 0x929   : > { %v1702_v27 = vpop.permute.xlu1 %1701 }
 0x92f   : > { %v3020_v20 = vpop.eup %3019 }
 0x930   : > { %v1524_v22 = vmul.f32 %v3020_v20, %v3012_v0 }
 0x932   : > { %v1526_v24 = vpack.c.bf16 %v1524_v22, %v1523_v21 }
 0x934   : > { %2811 = vmatmul.mubr.msk.bf16.vlgmr.msra.gmra.mxu0 %vm944_vm4, %v1526_v24 }
 0x935   : > { %2821 = vmatpush3.bf16.xpose.msra.mxu0 %v1709_v25  ;;  %2822 = vmatprep.mubr.msk.bf16.mxu0 %vm3159_vm2, %v3158_v2 }
 0x936   : > { %2832 = vmatprep.subr.bf16.mxu0 %v3158_v2 }
 0x93c   : > { %2823 = vmatmul.mubr.msk.bf16.vlgmr.msra.gmra.mxu0 %vm846_vm3, %v1702_v27 }
 0x93d   : > { %2834 = vmatprep.mubr.msk.bf16.mxu0 %vm3159_vm2, %v3158_v2 }
 0x9bb   : > { %v3550_v29 = vpop.f32.mrf.mxu1 }
 0x9bc   : > { %v2667_v9 = vpack.c.bf16 %v3550_v29, %v3550_v29 }
 0x9bd   : > { %v2806_v30 = vpop.f32.mrf.mxu1 }
 0x9bf   : > { %v3552_v31 = vpop.f32.mrf.mxu1 }
 0x9c0   : > { %v2668_v26 = vpack.c.bf16 %v3552_v31, %v3552_v31 }
 0x9c1   : > { %v2807_v32 = vpop.f32.mrf.mxu1 }
 0x9c3   : > { %v1694_v33 = vpop.f32.mrf.mxu1 }
 0x9c4   : > { %v1752_v34 = vsel %vm944_vm4, %v1694_v33, -inf }
 0x9c5   : > { %1753 = vmax.xlane.f32.xlu0 %v1752_v34  ;;  %v2818_v35 = vpop.f32.mrf.mxu1 }
 0x9c7   : > { %v1697_v37 = vpop.f32.mrf.mxu1 }
 0x9c8   : > { %v1755_v39 = vsel %vm944_vm4, %v1697_v37, -inf }
 0x9c9   : > { %1756 = vmax.xlane.f32.xlu1 %v1755_v39  ;;  %v2819_v40 = vpop.f32.mrf.mxu1 }
 0x9f4   : > { %v1614_v41 = vpop.f32.mrf.mxu0 }
 0x9f6   : > { %v2812_v42 = vpop.f32.mrf.mxu0 }
 0x9f8   : > { %v1617_v43 = vpop.f32.mrf.mxu0 }
 0x9f9   : > { %v2670_v36 = vpack.c.bf16 %v1617_v43, %v1617_v43 }
 0x9fa   : > { %v2813_v2 = vpop.f32.mrf.mxu0 }
 0x9fc   : > { %v1745_v44 = vpop.f32.mrf.mxu0 }
 0x9fd   : > { %v1758_v45 = vsel %vm944_vm4, %v1745_v44, -inf }
 0x9fe   : > { %1759 = vmax.xlane.f32.xlu0 %v1758_v45  ;;  %v2824_v46 = vpop.f32.mrf.mxu0  ;;  %v2953_v45 = vld [vmem:[%s3780_s18] sm:$0xff]  }
 0xa00   : > { %v1748_v47 = vpop.f32.mrf.mxu0 }
 0xa01   : > { %v1761_v48 = vsel %vm944_vm4, %v1748_v47, -inf }
 0xa02   : > { %1762 = vmax.xlane.f32.xlu0 %v1761_v48  ;;  %v2825_v49 = vpop.f32.mrf.mxu0 }
 0xa4e   : > { %v1754_v50 = vpop.xlane.xlu0 %1753 }
 0xa4f   : > { %v1764_v51 = vsub.f32 %v1694_v33, %v1754_v50 }
 0xa51   : > { %v1768_v52 = vmul.f32 1.442695, %v1764_v51 }
 0xa52   : > { %v1757_v53 = vpop.xlane.xlu1 %1756 }
 0xa53   : > { %3021 = vpow2.f32 %v1768_v52  ;;  %v1765_v54 = vsub.f32 %v1697_v37, %v1757_v53 }
 0xa55   : > { %v1770_v55 = vmul.f32 1.442695, %v1765_v54 }
 0xa57   : > { %3023 = vpow2.f32 %v1770_v55 }
 0xa60   : > { %v3022_v56 = vpop.eup %3021 }
 0xa61   : > { %v1776_v57 = vsel %vm944_vm4, %v3022_v56, 0.0 }
 0xa62   : > { %1777 = vadd.xlane.f32.xlu0 %v1776_v57 }
 0xa64   : > { %v3024_v58 = vpop.eup %3023 }
 0xa65   : > { %v1779_v59 = vsel %vm944_vm4, %v3024_v58, 0.0 }
 0xa66   : > { %1780 = vadd.xlane.f32.xlu1 %v1779_v59  ;;  %v2623_v59 = vld [vmem:[%s3781_s17] ss:$0 sm:$0xff] }
 0xa87   : > { %v1760_v60 = vpop.xlane.xlu0 %1759 }
 0xa88   : > { %v1766_v61 = vsub.f32 %v1745_v44, %v1760_v60  ;;  %v2952_v44 = vld [vmem:[%s3780_s18 + $0x8] sm:$0xff]  }
 0xa8a   : > { %v1772_v62 = vmul.f32 1.442695, %v1766_v61 }
 0xa8b   : > { %v1763_v63 = vpop.xlane.xlu0 %1762 }
 0xa8c   : > { %3025 = vpow2.f32 %v1772_v62  ;;  %v1767_v0 = vsub.f32 %v1748_v47, %v1763_v63 }
 0xa8e   : > { %v1774_v1 = vmul.f32 1.442695, %v1767_v0  ;;  %v3061_v0 = vld [vmem:[#allocation2] sm:$0xff] }
 0xa90   : > { %3027 = vpow2.f32 %v1774_v1 }
 0xa99   : > { %v3026_v3 = vpop.eup %3025 }
 0xa9a   : > { %v1782_v4 = vsel %vm944_vm4, %v3026_v3, 0.0 }
 0xa9b   : > { %1783 = vadd.xlane.f32.xlu0 %v1782_v4  ;;  %v3062_v4 = vld [vmem:[#allocation2 + $0x10] sm:$0xff] }
 0xa9d   : > { %v3028_v5 = vpop.eup %3027 }
 0xa9e   : > { %v1785_v6 = vsel %vm944_vm4, %v3028_v5, 0.0 }
 0xa9f   : > { %1786 = vadd.xlane.f32.xlu1 %v1785_v6 }
 0xab0   : > { %1845 = vrot.lane.b32.xlu1 %v3418_v13, %s3170_s19  ;;  %v2666_v13 = vpack.c.bf16 %v3518_v38, %v3518_v38 }
 0xab1   : > { %1798 = vrot.lane.b32.xlu0 %v3422_v18, %s3170_s19  ;;  %v2669_v18 = vpack.c.bf16 %v1614_v41, %v1614_v41 }
 0xab4   : > { %1362 = vrot.lane.b32.xlu1 %v2663_v7, %s3171_s22 }
 0xab5   : > { %1366 = vrot.lane.b32.xlu0 %v2665_v19, %s3171_s22 }
 0xab8   : > { %1364 = vrot.lane.b32.xlu1 %v2664_v8, %s3171_s22  ;;  %v3063_v8 = vld [vmem:[#allocation2 + $0x8] sm:$0xff] }
 0xab9   : > { %1633 = vrot.lane.b32.xlu0 %v2667_v9, %s3172_s23 }
 0xabc   : > { %1368 = vrot.lane.b32.xlu1 %v2666_v13, %s3171_s22  ;;  %v3064_v13 = vld [vmem:[#allocation2 + $0x18] sm:$0xff] }
 0xabd   : > { %1637 = vrot.lane.b32.xlu0 %v2669_v18, %s3172_s23 }
 0xac0   : > { %1635 = vrot.lane.b32.xlu1 %v2668_v26, %s3172_s23 }
 0xac4   : > { %1639 = vrot.lane.b32.xlu1 %v2670_v36, %s3172_s23 }
 0xaeb   : > { %v1778_v28 = vpop.xlane.xlu0 %1777 }
 0xaef   : > { %v1781_v10 = vpop.xlane.xlu1 %1780 }
 0xaf0   : > { %3029 = vrcp.f32 %v1781_v10 }
 0xaf1   : > { %3031 = vrcp.f32 %v1778_v28 }
 0xafd   : > { %v3030_v11 = vpop.eup %3029 }
 0xafe   : > { %v3032_v16 = vpop.eup %3031  ;;  %v1793_v14 = vmul.f32 %v3030_v11, %v3024_v58 }
 0xaff   : > { %v1792_v17 = vmul.f32 %v3032_v16, %v3022_v56 }
 0xb01   : > { %v1796_v20 = vpack.c.bf16 %v1793_v14, %v1792_v17 }
 0xb24   : > { %v1784_v12 = vpop.xlane.xlu0 %1783 }
 0xb25   : > { %3033 = vrcp.f32 %v1784_v12 }
 0xb28   : > { %v1787_v15 = vpop.xlane.xlu1 %1786  ;;  %v1799_v38 = vpop.permute.xlu0 %1798 }
 0xb29   : > { %3035 = vrcp.f32 %v1787_v15  ;;  %2827 = vmatpush3.bf16.msra.mxu1 %v1799_v38 }
 0xb2a   : > { %2838 = vmatprep.subr.bf16.mxu1 %v2952_v44 }
 0xb2c   : > { %v1846_v21 = vpop.permute.xlu1 %1845  ;;  %2829 = vmatmul.mubr.msk.bf16.vlgmr.msra.gmra.mxu1 %vm944_vm4, %v1796_v20  ;;  %v1367_v22 = vpop.permute.xlu0 %1366 }
 0xb2d   : > { %1377 = vst.msk [vmem:[#allocation3 + $0x8] sm:$0xf] %vm1374_vm6, %v1367_v22  ;;  %2833 = vmatpush3.bf16.msra.mxu0 %v1846_v21  ;;  %2839 = vmatpush3.bf16.msra.mxu1 %v2952_v44 }
 0xb2e   : > { %2840 = vmatprep.subr.bf16.mxu1 %v2953_v45 }
 0xb30   : > { %v1363_v23 = vpop.permute.xlu1 %1362  ;;  %v1634_v24 = vpop.permute.xlu0 %1633 }
 0xb31   : > { %1375 = vst.msk [vmem:[#allocation3] sm:$0xf] %vm1374_vm6, %v1363_v23  ;;  %2841 = vmatpush3.bf16.msra.mxu1 %v2953_v45 }
 0xb32   : > { %1646 = vst.msk [vmem:[#allocation3] sm:$0xf] %vm1645_vm7, %v1634_v24  ;;  %v3034_v25 = vpop.eup %3033 }
 0xb33   : > { %v1794_v31 = vmul.f32 %v3034_v25, %v3026_v3 }
 0xb34   : > { %v1365_v27 = vpop.permute.xlu1 %1364  ;;  %v1638_v29 = vpop.permute.xlu0 %1637 }
 0xb35   : > { %1376 = vst.msk [vmem:[#allocation3 + $0x4] sm:$0xf] %vm1374_vm6, %v1365_v27 }
 0xb36   : > { %1648 = vst.msk [vmem:[#allocation3 + $0x8] sm:$0xf] %vm1645_vm7, %v1638_v29  ;;  %v3036_v30 = vpop.eup %3035 }
 0xb37   : > { %v1795_v32 = vmul.f32 %v3036_v30, %v3028_v5 }
 0xb38   : > { %v1369_v33 = vpop.permute.xlu1 %1368 }
 0xb39   : > { %1378 = vst.msk [vmem:[#allocation3 + $0xc] sm:$0xf] %vm1374_vm6, %v1369_v33  ;;  %v1797_v34 = vpack.c.bf16 %v1795_v32, %v1794_v31 }
 0xb3b   : > { %2835 = vmatmul.mubr.msk.bf16.vlgmr.msra.gmra.mxu0 %vm944_vm4, %v1797_v34  ;;  %v2955_v34 = vld [vmem:[%s3354_s4 + $0x8] sm:$0xff]  }
 0xb3c   : > { %v1636_v35 = vpop.permute.xlu1 %1635  ;;  %2846 = vmatprep.subr.bf16.mxu0 %v2955_v34 }
 0xb3d   : > { %1647 = vst.msk [vmem:[#allocation3 + $0x4] sm:$0xf] %vm1645_vm7, %v1636_v35  ;;  %v2956_v35 = vld [vmem:[%s3354_s4] sm:$0xff]   ;;  %2847 = vmatpush3.bf16.msra.mxu0 %v2955_v34 }
 0xb3e   : > { %2848 = vmatprep.subr.bf16.mxu0 %v2956_v35 }
 0xb40   : > { %v1640_v37 = vpop.permute.xlu1 %1639 }
 0xb41   : > { %1649 = vst.msk [vmem:[#allocation3 + $0xc] sm:$0xf] %vm1645_vm7, %v1640_v37  ;;  %2849 = vmatpush3.bf16.msra.mxu0 %v2956_v35 }
 0xbec   : > { %v1838_v39 = vpop.f32.mrf.mxu1 }
 0xbed   : > { %v2671_v40 = vpack.c.bf16 %v1838_v39, %v1838_v39 }
 0xbee   : > { %v2830_v41 = vpop.f32.mrf.mxu1 }
 0xbef   : > { %1904 = vrot.lane.b32.xlu0 %v2671_v40, %s3173_s26 }
 0xbf0   : > { %v1841_v42 = vpop.f32.mrf.mxu1 }
 0xbf1   : > { %v2672_v43 = vpack.c.bf16 %v1841_v42, %v1841_v42 }
 0xbf2   : > { %v2831_v2 = vpop.f32.mrf.mxu1 }
 0xbf3   : > { %1906 = vrot.lane.b32.xlu1 %v2672_v43, %s3173_s26 }
 0xbfb   : > { %v1885_v46 = vpop.f32.mrf.mxu0 }
 0xbfc   : > { %v2673_v47 = vpack.c.bf16 %v1885_v46, %v1885_v46 }
 0xbfd   : > { %v2836_v48 = vpop.f32.mrf.mxu0 }
 0xbfe   : > { %1908 = vrot.lane.b32.xlu0 %v2673_v47, %s3173_s26 }
 0xbff   : > { %v1888_v49 = vpop.f32.mrf.mxu0 }
 0xc00   : > { %v2674_v50 = vpack.c.bf16 %v1888_v49, %v1888_v49 }
 0xc01   : > { %v2837_v51 = vpop.f32.mrf.mxu0 }
 0xc02   : > { %1910 = vrot.lane.b32.xlu1 %v2674_v50, %s3173_s26  ;;  %v2630_v51 = vld [vmem:[%s639_s3] ss:$0 sm:$0xff]  ;;  %s3083_s3 = scalar_lea.vmem %s3082_s14, 512 }
 0xc03   : > { %p3085_p9 = scmp.lt.s32.totalorder %s3083_s3, %s3077_s21 }
 0xc05   : > { %p3086_p10 = por %p3085_p9, %p3084_p7 }
 0xc07   : > { %p3087_p11 = pnand %p3086_p10, %p3080_p6 }
 0xc61   : > { %v1905_v52 = vpop.permute.xlu0 %1904 }
 0xc62   : > { %1917 = vst.msk [vmem:[#allocation3] sm:$0xf] %vm1916_vm8, %v1905_v52 }
 0xc65   : > { %v1907_v53 = vpop.permute.xlu1 %1906 }
 0xc66   : > { %1918 = vst.msk [vmem:[#allocation3 + $0x4] sm:$0xf] %vm1916_vm8, %v1907_v53 }
 0xc6d   : > { %v2951_v54 = vld [vmem:[#allocation3] sm:$0xff]  }
 0xc6e   : > { %2842 = vmatprep.mubr.msk.bf16.mxu1 %vm681_vm1, %v2951_v54 }
 0xc70   : > { %v1909_v55 = vpop.permute.xlu0 %1908 }
 0xc71   : > { %1919 = vst.msk [vmem:[#allocation3 + $0x8] sm:$0xf] %vm1916_vm8, %v1909_v55 }
 0xc74   : > { %v1911_v56 = vpop.permute.xlu1 %1910 }
 0xc75   : > { %1920 = vst.msk [vmem:[#allocation3 + $0xc] sm:$0xf] %vm1916_vm8, %v1911_v56 }
 0xc7c   : > { %v2954_v57 = vld [vmem:[#allocation3 + $0x8] sm:$0xff]  }
 0xc7d   : > { %2843 = vmatmul.mubr.msk.bf16.vlgmr.msra.gmra.mxu1 %vm681_vm1, %v2954_v57  ;;  %v2631_v57 = vld [vmem:[%s642_s29] ss:$0 sm:$0xff] }
 0xd3d   : > { %v2844_v58 = vpop.f32.mrf.mxu1 }
 0xd3e   : > { %v2007_v61 = vadd.f32 %v2844_v58, %v2623_v59 }
 0xd3f   : > { %v1998_v60 = vpop.f32.mrf.mxu1 }
 0xd40   : > { %v1999_v62 = vadd.f32 %v2623_v59, %v1998_v60  ;;  %v3597_v5 = vadd.f32 %v3062_v4, %v2007_v61 }
 0xd41   : > { %v2845_v63 = vpop.f32.mrf.mxu1 }
 0xd42   : > { %v3595_v1 = vadd.f32 %v3061_v0, %v1999_v62  ;;  %v2010_v6 = vadd.f32 %v2845_v63, %v2623_v59  ;;  %v2025_v36 = vsel %vm681_vm1, %v3597_v5, 0.0 }
 0xd43   : > { %v2001_v3 = vpop.f32.mrf.mxu1 }
 0xd44   : > { %v2002_v7 = vadd.f32 %v2623_v59, %v2001_v3  ;;  %v2019_v19 = vsel %vm681_vm1, %v3595_v1, 0.0  ;;  %v3603_v18 = vadd.f32 %v3064_v13, %v2010_v6  ;;  %v2959_v13 = vld [vmem:[%s3364_s28 + $0x28] sm:$0xff]  }
 0xd45   : > { %2020 = vadd.xlane.f32.xlu0 %v2019_v19  ;;  %v2957_v19 = vld [vmem:[%s3364_s28 + $0x38] sm:$0xff]  }
 0xd46   : > { %v3601_v9 = vadd.f32 %v3063_v8, %v2002_v7  ;;  %v2028_v10 = vsel %vm681_vm1, %v3603_v18, 0.0  ;;  %2854 = vmatprep.subr.bf16.mxu1 %v2957_v19  ;;  %v2958_v8 = vld [vmem:[%s3364_s28 + $0x30] sm:$0xff]  }
 0xd47   : > { %2855 = vmatpush3.bf16.msra.mxu1 %v2957_v19 }
 0xd48   : > { %v2022_v26 = vsel %vm681_vm1, %v3601_v9, 0.0  ;;  %2856 = vmatprep.subr.bf16.mxu1 %v2958_v8 }
 0xd49   : > { %2023 = vadd.xlane.f32.xlu1 %v2022_v26  ;;  %2026 = vadd.xlane.f32.xlu0 %v2025_v36  ;;  %v2960_v26 = vld [vmem:[%s3364_s28 + $0x20] sm:$0xff]   ;;  %v2961_v36 = vld [vmem:[%s3364_s28 + $0x18] sm:$0xff]  }
 0xd4b   : > { %2857 = vmatpush3.bf16.msra.mxu1 %v2958_v8 }
 0xd4c   : > { %2858 = vmatprep.subr.bf16.mxu1 %v2959_v13 }
 0xd4d   : > { %2029 = vadd.xlane.f32.xlu0 %v2028_v10  ;;  %v2962_v10 = vld [vmem:[%s3364_s28 + $0x10] sm:$0xff]  }
 0xd4f   : > { %2859 = vmatpush3.bf16.msra.mxu1 %v2959_v13 }
 0xd50   : > { %2860 = vmatprep.subr.bf16.mxu1 %v2960_v26 }
 0xd53   : > { %2861 = vmatpush3.bf16.msra.mxu1 %v2960_v26 }
 0xd54   : > { %2862 = vmatprep.subr.bf16.mxu1 %v2961_v36 }
 0xd57   : > { %2863 = vmatpush3.bf16.msra.mxu1 %v2961_v36 }
 0xd58   : > { %2864 = vmatprep.subr.bf16.mxu1 %v2962_v10 }
 0xd5b   : > { %2865 = vmatpush3.bf16.msra.mxu1 %v2962_v10 }
 0xdce   : > { %v2021_v28 = vpop.xlane.xlu0 %2020 }
 0xdcf   : > { %v2031_v11 = vmul.f32 0.03125, %v2021_v28  ;;  %v2963_v28 = vld [vmem:[%s3364_s28 + $0x8] sm:$0xff]  }
 0xdd0   : > { %2866 = vmatprep.subr.bf16.mxu1 %v2963_v28 }
 0xdd1   : > { %v2035_v12 = vsub.f32 %v3595_v1, %v2031_v11  ;;  %2867 = vmatpush3.bf16.msra.mxu1 %v2963_v28  ;;  %v2964_v11 = vld [vmem:[%s3364_s28] sm:$0xff]   ;;  %s2874_s28 = scalar_select %p3292_p8, [#allocation5], [#allocation8] }
 0xdd2   : > { %v2024_v16 = vpop.xlane.xlu1 %2023  ;;  %v2027_v14 = vpop.xlane.xlu0 %2026  ;;  %2868 = vmatprep.subr.bf16.mxu1 %v2964_v11 }
 0xdd3   : > { %v2032_v15 = vmul.f32 0.03125, %v2024_v16  ;;  %v2033_v38 = vmul.f32 0.03125, %v2027_v14  ;;  %v2039_v17 = vmul.f32 %v2035_v12, %v2035_v12  ;;  %s2362_s23 = sld [smem:[%s2874_s28 + %s3797_s20]] }
 0xdd4   : > { %s3783_s20 = sld [smem:[#allocation12_spill]] }
 0xdd5   : > { %v2036_v20 = vsub.f32 %v3601_v9, %v2032_v15  ;;  %v2037_v21 = vsub.f32 %v3597_v5, %v2033_v38  ;;  %v2043_v22 = vsel %vm681_vm1, %v2039_v17, 0.0  ;;  %2869 = vmatpush3.bf16.msra.mxu1 %v2964_v11 }
 0xdd6   : > { %2044 = vadd.xlane.f32.xlu0 %v2043_v22  ;;  %v2030_v23 = vpop.xlane.xlu0 %2029 }
 0xdd7   : > { %v2034_v24 = vmul.f32 0.03125, %v2030_v23  ;;  %v2040_v25 = vmul.f32 %v2036_v20, %v2036_v20  ;;  %v2041_v27 = vmul.f32 %v2037_v21, %v2037_v21 }
 0xdd9   : > { %v2038_v29 = vsub.f32 %v3603_v18, %v2034_v24  ;;  %v2046_v30 = vsel %vm681_vm1, %v2040_v25, 0.0  ;;  %v2049_v31 = vsel %vm681_vm1, %v2041_v27, 0.0 }
 0xdda   : > { %2047 = vadd.xlane.f32.xlu1 %v2046_v30  ;;  %2050 = vadd.xlane.f32.xlu0 %v2049_v31  ;;  %s3785_s17 = sand.u32 1, %s3783_s20  }
 0xddb   : > { %v2042_v32 = vmul.f32 %v2038_v29, %v2038_v29  ;;  %s3682_s4 = scalar_lea.sflag [#allocation7], %s3785_s17 }
 0xddd   : > { %v2052_v33 = vsel %vm681_vm1, %v2042_v32, 0.0 }
 0xdde   : > { %2053 = vadd.xlane.f32.xlu1 %v2052_v33 }
 0xe5f   : > { %v2045_v37 = vpop.xlane.xlu0 %2044 }
 0xe60   : > { %v2055_v39 = vmul.f32 0.03125, %v2045_v37 }
 0xe62   : > { %v2059_v40 = vadd.f32 1e-05, %v2055_v39 }
 0xe63   : > { %v2048_v41 = vpop.xlane.xlu1 %2047  ;;  %v2051_v42 = vpop.xlane.xlu0 %2050 }
 0xe64   : > { %3037 = vrsqrt.f32 %v2059_v40  ;;  %v2056_v43 = vmul.f32 0.03125, %v2048_v41  ;;  %v2057_v2 = vmul.f32 0.03125, %v2051_v42 }
 0xe66   : > { %v2060_v44 = vadd.f32 1e-05, %v2056_v43  ;;  %v2061_v45 = vadd.f32 1e-05, %v2057_v2 }
 0xe67   : > { %v2054_v46 = vpop.xlane.xlu1 %2053 }
 0xe68   : > { %3039 = vrsqrt.f32 %v2060_v44  ;;  %v2058_v47 = vmul.f32 0.03125, %v2054_v46 }
 0xe69   : > { %3041 = vrsqrt.f32 %v2061_v45 }
 0xe6a   : > { %v2062_v48 = vadd.f32 1e-05, %v2058_v47 }
 0xe6c   : > { %3043 = vrsqrt.f32 %v2062_v48 }
 0xe71   : > { %v3038_v49 = vpop.eup %3037 }
 0xe72   : > { %v2067_v50 = vmul.f32 %v3038_v49, %v2035_v12  ;;  %v2632_v12 = vld [vmem:[%s650_s6] ss:$0 sm:$0xff] }
 0xe74   : > { %v2077_v55 = vmul.f32 %v2630_v51, %v2067_v50 }
 0xe75   : > { %v3040_v52 = vpop.eup %3039 }
 0xe76   : > { %v3042_v53 = vpop.eup %3041  ;;  %v2068_v54 = vmul.f32 %v3040_v52, %v2036_v20  ;;  %v2087_v61 = vadd.f32 %v2631_v57, %v2077_v55 }
 0xe77   : > { %v2069_v56 = vmul.f32 %v3042_v53, %v2037_v21 }
 0xe78   : > { %v2078_v58 = vmul.f32 %v2630_v51, %v2068_v54 }
 0xe79   : > { %v3044_v59 = vpop.eup %3043  ;;  %v2079_v63 = vmul.f32 %v2630_v51, %v2069_v56  ;;  %v2637_v56 = vld [vmem:[%s658_s0] ss:$0 sm:$0xff]  ;;  %s2679_s0 = sshll.u32 %s2362_s23, 8 }
 0xe7a   : > { %v2070_v60 = vmul.f32 %v3044_v59, %v2038_v29  ;;  %v2088_v62 = vadd.f32 %v2631_v57, %v2078_v58  ;;  %s3676_s30 = scalar_lea.hbm %s3784_s15, %s2679_s0 }
 0xe7b   : > { %v2089_v4 = vadd.f32 %v2631_v57, %v2079_v63 }
 0xe7c   : > { %v2091_v0 = vpack.c.bf16 %v2088_v62, %v2087_v61  ;;  %v2080_v3 = vmul.f32 %v2630_v51, %v2070_v60 }
 0xe7e   : > { %2850 = vmatprep.mubr.msk.bf16.mxu0 %vm681_vm1, %v2091_v0  ;;  %v2090_v6 = vadd.f32 %v2631_v57, %v2080_v3 }
 0xe80   : > { %v2092_v7 = vpack.c.bf16 %v2090_v6, %v2089_v4 }
 0xe82   : > { %2851 = vmatmul.mubr.msk.bf16.vlgmr.msra.gmra.mxu0 %vm681_vm1, %v2092_v7 }
 0xf42   : > { %v2852_v16 = vpop.f32.mrf.mxu0 }
 0xf43   : > { %v2165_v14 = vadd.f32 %v2852_v16, %v2632_v12 }
 0xf44   : > { %v2156_v15 = vpop.f32.mrf.mxu0 }
 0xf45   : > { %v2173_v38 = vmul.f32 1.702, %v2165_v14  ;;  %v2157_v17 = vadd.f32 %v2632_v12, %v2156_v15 }
 0xf46   : > { %v2853_v20 = vpop.f32.mrf.mxu0 }
 0xf47   : > { %v2177_v21 = vsub.f32 0.0, %v2173_v38  ;;  %v2171_v22 = vmul.f32 1.702, %v2157_v17  ;;  %v2168_v23 = vadd.f32 %v2853_v20, %v2632_v12 }
 0xf48   : > { %v2159_v24 = vpop.f32.mrf.mxu0 }
 0xf49   : > { %v2183_v25 = vmul.f32 1.442695, %v2177_v21  ;;  %v2175_v27 = vsub.f32 0.0, %v2171_v22  ;;  %v2174_v29 = vmul.f32 1.702, %v2168_v23  ;;  %v2160_v30 = vadd.f32 %v2632_v12, %v2159_v24 }
 0xf4b   : > { %v2179_v31 = vmul.f32 1.442695, %v2175_v27  ;;  %v2178_v32 = vsub.f32 0.0, %v2174_v29  ;;  %v2172_v33 = vmul.f32 1.702, %v2160_v30  ;;  %3045 = vpow2.f32 %v2183_v25 }
 0xf4d   : > { %3047 = vpow2.f32 %v2179_v31  ;;  %v2185_v34 = vmul.f32 1.442695, %v2178_v32  ;;  %v2176_v35 = vsub.f32 0.0, %v2172_v33 }
 0xf4f   : > { %3049 = vpow2.f32 %v2185_v34  ;;  %v2181_v37 = vmul.f32 1.442695, %v2176_v35 }
 0xf51   : > { %3051 = vpow2.f32 %v2181_v37 }
 0xf58   : > { %v3046_v39 = vpop.eup %3045 }
 0xf59   : > { %v2189_v43 = vadd.f32 1.0, %v3046_v39 }
 0xf5a   : > { %v3048_v40 = vpop.eup %3047 }
 0xf5b   : > { %v2187_v41 = vadd.f32 1.0, %v3048_v40 }
 0xf5c   : > { %v3050_v42 = vpop.eup %3049 }
 0xf5d   : > { %v2190_v2 = vadd.f32 1.0, %v3050_v42  ;;  %3053 = vrcp.f32 %v2187_v41 }
 0xf5e   : > { %v3052_v44 = vpop.eup %3051 }
 0xf5f   : > { %3055 = vrcp.f32 %v2190_v2  ;;  %v2188_v45 = vadd.f32 1.0, %v3052_v44 }
 0xf60   : > { %3057 = vrcp.f32 %v2189_v43 }
 0xf61   : > { %3059 = vrcp.f32 %v2188_v45 }
 0xf6a   : > { %v3054_v46 = vpop.eup %3053 }
 0xf6b   : > { %v2199_v51 = vmul.f32 %v3054_v46, %v2157_v17 }
 0xf6c   : > { %v3056_v47 = vpop.eup %3055 }
 0xf6d   : > { %v3058_v48 = vpop.eup %3057  ;;  %v2202_v50 = vmul.f32 %v3056_v47, %v2168_v23 }
 0xf6e   : > { %v3060_v49 = vpop.eup %3059  ;;  %v2201_v53 = vmul.f32 %v3058_v48, %v2165_v14 }
 0xf6f   : > { %v2200_v52 = vmul.f32 %v3060_v49, %v2160_v30 }
 0xf70   : > { %v2204_v55 = vpack.c.bf16 %v2202_v50, %v2201_v53 }
 0xf71   : > { %v2203_v54 = vpack.c.bf16 %v2200_v52, %v2199_v51 }
 0xf73   : > { %2870 = vmatprep.mubr.bf16.mxu1 %v2203_v54 }
 0xf74   : > { %2871 = vmatmul.mubr.bf16.vlgmr.msra.gmra.mxu1 %v2204_v55 }
0x1034   : > { %v2872_v57 = vpop.f32.mrf.mxu1 }
0x1035   : > { %v2319_v58 = vadd.f32 %v2872_v57, %v2637_v56 }
0x1036   : > { %v2310_v59 = vpop.f32.mrf.mxu1 }
0x1037   : > { %v2327_v60 = vadd.f32 %v2319_v58, %v3597_v5  ;;  %v2311_v61 = vadd.f32 %v2637_v56, %v2310_v59 }
0x1038   : > { %v2873_v62 = vpop.f32.mrf.mxu1 }
0x1039   : > { %2331 = vst.msk [vmem:[#allocation2 + $0x10] sm:$0xff] %vm681_vm1, %v2327_v60  ;;  %v2677_v63 = vpack.c.bf16 %v2327_v60, %v2327_v60  ;;  %v2325_v0 = vadd.f32 %v2311_v61, %v3595_v1  ;;  %v2322_v3 = vadd.f32 %v2873_v62, %v2637_v56 }
0x103a   : > { %v2313_v4 = vpop.f32.mrf.mxu1 }
0x103b   : > { %2352 = vst.msk [vmem:[%s3370_s16 + $0x8] sm:$0xf] %vm2349_vm9, %v2677_v63  ;;  %v2675_v6 = vpack.c.bf16 %v2325_v0, %v2325_v0  ;;  %v2328_v5 = vadd.f32 %v2322_v3, %v3603_v18  ;;  %v2314_v7 = vadd.f32 %v2637_v56, %v2313_v4 }
0x103c   : > { %2329 = vst.msk [vmem:[#allocation2] sm:$0xff] %vm681_vm1, %v2325_v0 }
0x103d   : > { %2350 = vst.msk [vmem:[%s3370_s16] sm:$0xf] %vm2349_vm9, %v2675_v6  ;;  %v2678_v1 = vpack.c.bf16 %v2328_v5, %v2328_v5  ;;  %v2326_v19 = vadd.f32 %v2314_v7, %v3601_v9 }
0x103e   : > { %2332 = vst.msk [vmem:[#allocation2 + $0x18] sm:$0xff] %vm681_vm1, %v2328_v5 }
0x103f   : > { %2353 = vst.msk [vmem:[%s3370_s16 + $0xc] sm:$0xf] %vm2349_vm9, %v2678_v1  ;;  %v2676_v18 = vpack.c.bf16 %v2326_v19, %v2326_v19 }
0x1040   : > { %2330 = vst.msk [vmem:[#allocation2 + $0x8] sm:$0xff] %vm681_vm1, %v2326_v19 }
0x1041   : > { %2351 = vst.msk [vmem:[%s3370_s16 + $0x4] sm:$0xf] %vm2349_vm9, %v2676_v18 }
0x1042   : > { %3090 = shalt.err (!%p3087_p11)
}
0x1043   : > { %s3091_s16 = scalar_lea.hbm %s3676_s30, 256  ;;  %s3095_s19 = scalar_lea.hbm %s3784_s15, 512 }
0x1044   : > { %p3092_p12 = scmp.ne.s32.totalorder %s3676_s30, %s3091_s16  ;;  %p3096_p2 = scmp.lt.s32.totalorder %s3676_s30, %s3784_s15 }
0x1045   : > { %p3097_p3 = scmp.lt.s32.totalorder %s3095_s19, %s3091_s16 }
0x1046   : > { %p3093_p0 = pnand %p3092_p12, %p3292_p8 }
0x1047   : > { %p3098_p4 = por %p3097_p3, %p3096_p2 }
0x1048   : > { %p3094_p1 = pneg %p3093_p0 }
0x104a   : > { %p3099_p5 = pnand %p3098_p4, %p3094_p1 }
0x104c   : > { %3102 = shalt.err (!%p3099_p5)
}
0x104d   : > { %s3175_s20 = smov 4  }
0x104e   : > { %2876 = dma.vmem_to_hbm [thread:$0]  (%p3292_p8), %s3668_s24, 256, %s3676_s30, %s3682_s4, %s3161_s27, %s3161_s27, %s3175_s20  }
0x104f PF: > { %s3786_s0 = sld [smem:[#allocation15_spill]] }
0x1050   : > { %s3787_s18 = sld [smem:[#allocation11_spill]] }
0x1055   : > { %p2882_p6 = scmp.ge.s32.totalorder %s3786_s0, 2 }
0x1056   : > { %s2387_s17 = sand.u32 1, %s3787_s18  }
0x1057   : > { %p2879_p7 = pnand %p2882_p6, %p3301_p13  ;;  %s2388_s21 = scalar_lea.sflag [#allocation7], %s2387_s17 }
0x1059   : > { %p2880_p9 = pneg %p2879_p7 }
0x105b   : > { %3130 = dma.done.wait (%p2880_p9), %s2388_s21, 256  }
0x105c   : > { %3132 = vsyncadd (%p2880_p9), %s2388_s21, 4294967040  ;;  %s33_s22 = sadd.s32 1, %s3786_s0   ;;  %s3789_s18 = sld [smem:[#allocation12_spill]] }
0x105d   : > { %p30_p10 = scmp.ge.s32.totalorder %s33_s22, 4   ;;  %s3790_s19 = sld [smem:[#allocation13_spill]] }
0x105e   : > { %s3791_s0 = sld [smem:[#allocation19_spill]] }
0x105f   : > { %s3792_s20 = sld [smem:[#allocation14_spill]]  ;;  %32 = sbr.rel (!%p30_p10) target bundleno = 21 (0x15), region = 147 }
0x1060   : > { %s3793_s21 = sld [smem:[#allocation16_spill]] }
0x1064   :  { %2393 = vsyncpa [#allocation7], 1 }
0x1065   :  { %2395 = vsyncpa [#allocation7 + $0x1], 1 }

</bundles_post_ra>
